<compile_context>
chip_gen: v7x
topology: tpu7x:2x2x1
jax: 0.10.0
libtpu: 0.0.40
codegen_flags: <defaults>
</compile_context>

<pallas_src>
import functools

import numpy as np

import jax
import jax.numpy as jnp
from jax.experimental import pallas as pl
from jax.experimental.pallas import tpu as pltpu

VMEM = pltpu.MemorySpace.VMEM
SMEM = pltpu.MemorySpace.SMEM

# Sub-pixel tap -> kernel-element map shared by every stride-2 layer here:
# tap (dh, dw) in {0,1}^2 of output phase (rh, rw) uses kernel element
# (KMAP[rh][dh], KMAP[rw][dw]); phase (rh, rw) shifts its base by (rh, rw).
_KMAP = ((3, 1), (2, 0))


# ----------------------------- Pallas kernels -----------------------------

def _sa_conv1_kernel(z_ref, wh_ref, wv_ref, w1_ref, scale_ref, o_ref):
    """SelfAttention (1x1 map) + ConvTranspose2d(nz, 8ngf, 4, 1, 0), linear out.

    With a 1x1 feature map the attention matrix is 1x1 and Softmax(dim=1) == 1,
    so the block reduces exactly to   out = x + Scale * Values(Hidden(x)).
    The 4x4 transposed conv on a 1x1 input is a plain dense matmul; its
    BatchNorm + ReLU is applied in the next kernel's preamble.
    """
    z = z_ref[...]                                                     # (B, nz)
    h = jnp.dot(z, wh_ref[...], preferred_element_type=jnp.float32)    # (B, nz)
    v = jnp.dot(h, wv_ref[...], preferred_element_type=jnp.float32)    # (B, nz)
    sa = z + scale_ref[0] * v
    o_ref[...] = jnp.dot(sa.astype(jnp.bfloat16), w1_ref[...],
                         preferred_element_type=jnp.float32)           # (B, 16*C1)


def _bn_relu_convT_kernel(x_ref, mask_ref, gamma_ref, beta_ref, w_ref, o_ref,
                          xs_ref, *, inv_n, wp, n_cols, final_tanh):
    """[BatchNorm(train)+ReLU of previous layer] + sub-pixel ConvT(k=4, s=2).

    x_ref:    (Cin, Lin)     previous layer's *linear* output, spatially
              zero-padded, flattened and transposed by the wrapper
              (channels on sublanes, flat (b, h, w) positions on lanes).
    mask_ref: (1, Lin)       1.0 at real activation positions, 0.0 at padding.
    w_ref:    (4*Cout, 4*Cin) packed phase weights (bf16), rows = (phase, cout),
              cols = (tap dh*2+dw, cin).
    o_ref:    (4*Cout, n_cols) unified phase outputs; phase (rh, rw) lives in
              rows [ph*Cout, (ph+1)*Cout) at columns shifted by rh*wp + rw.
    xs_ref:   (Cin, Lin)     VMEM scratch with the normalized activations.
    """
    x = x_ref[...]
    mask = mask_ref[...]
    # BatchNorm2d training mode: biased batch stats over (N, H, W) == masked
    # row-wise reductions in this layout.
    xm = x * mask
    s = jnp.sum(xm, axis=1, keepdims=True)
    ss = jnp.sum(xm * x, axis=1, keepdims=True)
    mean = s * inv_n
    var = ss * inv_n - mean * mean
    xn = (x - mean) * jax.lax.rsqrt(var + 1e-5) * gamma_ref[...] + beta_ref[...]
    # ReLU, then re-zero the padding/tail columns (conv taps must see zeros).
    xs_ref[...] = jnp.maximum(xn, 0.0) * mask

    # Shared taps {0,1}^2 for every output phase -> one patch gather and one
    # GEMM for all four phases.
    offs = (0, 1, wp, wp + 1)
    patches = jnp.concatenate(
        [xs_ref[:, off:off + n_cols] for off in offs], axis=0)   # (4*Cin, n_cols)
    y = jnp.dot(w_ref[...], patches.astype(jnp.bfloat16),
                preferred_element_type=jnp.float32)              # (4*Cout, n_cols)
    if final_tanh:
        y = jnp.tanh(y)
    o_ref[...] = y


# --------------------------- pallas_call wrappers ---------------------------

def _sa_conv1(z, p):
    B = z.shape[0]
    n_out = p["w1m"].shape[1]
    return pl.pallas_call(
        _sa_conv1_kernel,
        out_shape=jax.ShapeDtypeStruct((B, n_out), jnp.float32),
        in_specs=[pl.BlockSpec(memory_space=VMEM)] * 4
                 + [pl.BlockSpec(memory_space=SMEM)],
        out_specs=pl.BlockSpec(memory_space=VMEM),
    )(z, p["wh"], p["wv"], p["w1m"], p["scale"])


def _bn_relu_convT(x, mask, gamma, beta, w_all, wp, n_cols, n_valid, final_tanh):
    cin, lin = x.shape
    m_rows = w_all.shape[0]                      # 4 * Cout
    kern = functools.partial(_bn_relu_convT_kernel, inv_n=1.0 / float(n_valid),
                             wp=int(wp), n_cols=int(n_cols),
                             final_tanh=final_tanh)
    return pl.pallas_call(
        kern,
        out_shape=jax.ShapeDtypeStruct((m_rows, n_cols), jnp.float32),
        in_specs=[pl.BlockSpec(memory_space=VMEM)] * 5,
        out_specs=pl.BlockSpec(memory_space=VMEM),
        scratch_shapes=[pltpu.VMEM((cin, lin), jnp.float32)],
    )(x, mask, gamma, beta, w_all)


# ------------------------------ glue helpers -------------------------------

def _pack_convT_weight(w):
    """torch ConvTranspose2d weight (Cin, Cout, 4, 4) -> (4*Cout, 4*Cin) bf16.

    Rows ordered (phase rh*2+rw, cout); cols ordered (tap dh*2+dw, cin).
    """
    rows = []
    for rh in range(2):
        for rw in range(2):
            blocks = [w[:, :, _KMAP[rh][dh], _KMAP[rw][dw]].T   # (Cout, Cin)
                      for dh in range(2) for dw in range(2)]
            rows.append(jnp.concatenate(blocks, axis=1))        # (Cout, 4*Cin)
    return jnp.concatenate(rows, axis=0).astype(jnp.bfloat16)   # (4*Cout, 4*Cin)


def _valid_mask(B, hp, wp, lo, hi, tail):
    """(1, B*hp*wp + tail) f32 mask: 1 at real-data positions, 0 at padding."""
    m = np.zeros((B, hp, wp), np.float32)
    m[:, lo:hi, lo:hi] = 1.0
    m = m.reshape(1, -1)
    return jnp.asarray(np.pad(m, ((0, 0), (0, tail))))


def _to_kernel_input(x_cbhw, pad, tail):
    """(C, B, H, W) -> zero-pad spatially, flatten to (C, B*Hp*Wp + tail)."""
    c, b, h, w = x_cbhw.shape
    x = jnp.pad(x_cbhw, ((0, 0), (0, 0), (pad, pad), (pad, pad)))
    x = x.reshape(c, b * (h + 2 * pad) * (w + 2 * pad))
    return jnp.pad(x, ((0, 0), (0, tail)))


def _interleave_phases(yall, B, cout, hp, wp, hm, wm):
    """(4*Cout, B*hp*wp + wp + 1) unified output -> (Cout, B, 2*hm, 2*wm)."""
    lin0 = B * hp * wp
    planes = []
    for rh in range(2):
        for rw in range(2):
            ph = rh * 2 + rw
            shift = rh * wp + rw
            blk = yall[ph * cout:(ph + 1) * cout, shift:shift + lin0]
            planes.append(blk.reshape(cout, B, hp, wp)[:, :, :hm, :wm])
    p = jnp.stack(planes, axis=0).reshape(2, 2, cout, B, hm, wm)
    p = jnp.transpose(p, (2, 3, 4, 0, 5, 1))        # (co, b, m, rh, n, rw)
    return p.reshape(cout, B, 2 * hm, 2 * wm)


# --------------------------------- model -----------------------------------

def init_generator_params(key, latent_dim=32, gen_feat=8, gen_chan=1):
    nz, ngf, nc = latent_dim, gen_feat, gen_chan
    c1, c2, c3 = 8 * ngf, 4 * ngf, 2 * ngf
    ks = jax.random.split(key, 6)

    def normal(k, shape, fan_in):
        return jax.random.normal(k, shape, jnp.float32) / jnp.sqrt(float(fan_in))

    # SelfAttention at SA_depth=0 (input = hidden = nz).  Keys/Queries exist in
    # the torch module but are provably unused on a 1x1 feature map.
    wh = normal(ks[0], (nz, nz), nz)                 # Hidden 1x1 conv (as matmul)
    wv = normal(ks[1], (nz, nz), nz)                 # Values 1x1 conv (as matmul)
    scale = jnp.zeros((1,), jnp.float32)             # nn.Parameter(torch.zeros(1))

    # ConvTranspose2d weights, torch layout (Cin, Cout, kH, kW).
    w1 = normal(ks[2], (nz, c1, 4, 4), nz * 16)
    w2 = normal(ks[3], (c1, c2, 4, 4), c1 * 16)
    w3 = normal(ks[4], (c2, c3, 4, 4), c2 * 16)
    w4 = normal(ks[5], (c3, nc, 4, 4), c3 * 16)

    # Pre-packed kernel operands (hoisted out of the forward pass).
    w1m = jnp.transpose(w1, (0, 2, 3, 1)).reshape(nz, 16 * c1).astype(jnp.bfloat16)
    w2ph = _pack_convT_weight(w2)                    # (4*c2, 4*c1)
    w3ph = _pack_convT_weight(w3)                    # (4*c3, 4*c2)
    w4ph = _pack_convT_weight(w4)                    # (4*nc, 4*c3)

    def bn(c):
        return jnp.ones((c, 1), jnp.float32), jnp.zeros((c, 1), jnp.float32)

    g1, b1 = bn(c1)
    g2, b2 = bn(c2)
    g3, b3 = bn(c3)

    return dict(wh=wh, wv=wv, scale=scale, w1m=w1m,
                w2ph=w2ph, w3ph=w3ph, w4ph=w4ph,
                g1=g1, b1=b1, g2=g2, b2=b2, g3=g3, b3=b3)


def generator_forward(z, params, latent_dim=32):
    p = params
    B = z.shape[0]
    z = z.reshape(B, latent_dim).astype(jnp.float32)   # torch: z.view(-1, nz, 1, 1)

    c1 = p["w1m"].shape[1] // 16     # 8*ngf
    c2 = p["w2ph"].shape[0] // 4     # 4*ngf
    c3 = p["w3ph"].shape[0] // 4     # 2*ngf
    c4 = p["w4ph"].shape[0] // 4     # nc

    # --- Module 0+1: SelfAttention + ConvT(nz->c1, 4, 1, 0): 1x1 -> 4x4 -------
    y1 = _sa_conv1(z, p)                                         # (B, 16*c1)
    x = jnp.transpose(y1.reshape(B, 4, 4, c1), (3, 0, 1, 2))     # (c1, B, 4, 4)

    # --- Module 2: BN1+ReLU fused, ConvT(c1->c2, 4, 2, 1): 4x4 -> 8x8 ---------
    wp = 6                                                        # padded 6x6 grid
    n_cols, tail = B * 36 + wp + 1, 2 * (wp + 1)
    xin = _to_kernel_input(x, pad=1, tail=tail)                   # (c1, B*36+tail)
    mask = _valid_mask(B, 6, 6, 1, 5, tail)
    y2 = _bn_relu_convT(xin, mask, p["g1"], p["b1"], p["w2ph"], wp, n_cols,
                        n_valid=B * 16, final_tanh=False)         # (4*c2, n_cols)
    x = _interleave_phases(y2, B, c2, 6, 6, 4, 4)                 # (c2, B, 8, 8)

    # --- Module 3: BN2+ReLU fused, ConvT(c2->c3, 4, 2, 1): 8x8 -> 16x16 -------
    wp = 10                                                       # padded 10x10
    n_cols, tail = B * 100 + wp + 1, 2 * (wp + 1)
    xin = _to_kernel_input(x, pad=1, tail=tail)                   # (c2, B*100+tail)
    mask = _valid_mask(B, 10, 10, 1, 9, tail)
    y3 = _bn_relu_convT(xin, mask, p["g2"], p["b2"], p["w3ph"], wp, n_cols,
                        n_valid=B * 64, final_tanh=False)         # (4*c3, n_cols)
    x = _interleave_phases(y3, B, c3, 10, 10, 8, 8)               # (c3, B, 16, 16)

    # --- Module 4: BN3+ReLU fused, ConvT(c3->nc, 4, 2, 3) + Tanh: 16 -> 28 ----
    wp = 16                                                       # raw 16x16 grid
    n_cols, tail = B * 256 + wp + 1, 2 * (wp + 1)
    xin = _to_kernel_input(x, pad=0, tail=tail)                   # (c3, B*256+tail)
    mask = _valid_mask(B, 16, 16, 0, 16, tail)
    y4 = _bn_relu_convT(xin, mask, p["g3"], p["b3"], p["w4ph"], wp, n_cols,
                        n_valid=B * 256, final_tanh=True)         # (4*nc, n_cols)
    out_cb = _interleave_phases(y4, B, c4, 16, 16, 14, 14)        # (nc, B, 28, 28)

    return jnp.transpose(out_cb, (1, 0, 2, 3))                    # NCHW


if __name__ == "__main__":
    key = jax.random.PRNGKey(0)
    pkey, zkey = jax.random.split(key)

    latent_dim, gen_feat, gen_chan = 32, 8, 1    # small shapes; out (B, 1, 28, 28)
    B = 2

    params = init_generator_params(pkey, latent_dim, gen_feat, gen_chan)
    z = jax.random.normal(zkey, (B, latent_dim), jnp.float32)

    fwd = jax.jit(functools.partial(generator_forward, latent_dim=latent_dim))
    out = fwd(z, params)
    jax.block_until_ready(out)

    assert out.shape == (B, gen_chan, 28, 28), out.shape
    assert bool(jnp.all(jnp.isfinite(out)))
    print("KERNEL_OK")
</pallas_src>

<mosaic_0001>
module attributes {stable_mosaic.version = 11 : i64} {
  func.func @_sa_conv1_kernel(%arg0: memref<2x32xf32, #tpu.memory_space<vmem>>, %arg1: memref<32x32xf32, #tpu.memory_space<vmem>>, %arg2: memref<32x32xf32, #tpu.memory_space<vmem>>, %arg3: memref<32x1024xbf16, #tpu.memory_space<vmem>>, %arg4: memref<1xf32, #tpu.memory_space<smem>>, %arg5: memref<2x1024xf32, #tpu.memory_space<vmem>>) attributes {dimension_semantics = [], scalar_prefetch = 0 : i64, scratch_operands = 0 : i64, tpu.core_type = #tpu.core_type<tc>} {
    %c0 = arith.constant 0 : index
    %c0_0 = arith.constant 0 : index
    %0 = vector.load %arg0[%c0, %c0_0] : memref<2x32xf32, #tpu.memory_space<vmem>>, vector<2x32xf32>
    %c0_1 = arith.constant 0 : index
    %c0_2 = arith.constant 0 : index
    %1 = vector.load %arg1[%c0_1, %c0_2] : memref<32x32xf32, #tpu.memory_space<vmem>>, vector<32x32xf32>
    %cst = arith.constant dense<0.000000e+00> : vector<2x32xf32>
    %2 = tpu.matmul %0, %1, %cst {dimension_numbers = #tpu.dot_dimension_numbers<[1], [0], [0], [1], [0, 0, 1, 1], [], []>} : vector<2x32xf32>, vector<32x32xf32>, vector<2x32xf32> -> vector<2x32xf32>
    %c0_3 = arith.constant 0 : index
    %c0_4 = arith.constant 0 : index
    %3 = vector.load %arg2[%c0_3, %c0_4] : memref<32x32xf32, #tpu.memory_space<vmem>>, vector<32x32xf32>
    %cst_5 = arith.constant dense<0.000000e+00> : vector<2x32xf32>
    %4 = tpu.matmul %2, %3, %cst_5 {dimension_numbers = #tpu.dot_dimension_numbers<[1], [0], [0], [1], [0, 0, 1, 1], [], []>} : vector<2x32xf32>, vector<32x32xf32>, vector<2x32xf32> -> vector<2x32xf32>
    %c0_6 = arith.constant 0 : index
    %5 = memref.load %arg4[%c0_6] : memref<1xf32, #tpu.memory_space<smem>>
    %6 = vector.broadcast %5 : f32 to vector<2x32xf32>
    %7 = arith.mulf %6, %4 : vector<2x32xf32>
    %8 = arith.addf %0, %7 : vector<2x32xf32>
    %9 = arith.truncf %8 : vector<2x32xf32> to vector<2x32xbf16>
    %c0_7 = arith.constant 0 : index
    %c0_8 = arith.constant 0 : index
    %10 = vector.load %arg3[%c0_7, %c0_8] : memref<32x1024xbf16, #tpu.memory_space<vmem>>, vector<32x1024xbf16>
    %cst_9 = arith.constant dense<0.000000e+00> : vector<2x1024xf32>
    %11 = tpu.matmul %9, %10, %cst_9 {dimension_numbers = #tpu.dot_dimension_numbers<[1], [0], [0], [1], [0, 0, 1, 1], [], []>} : vector<2x32xbf16>, vector<32x1024xbf16>, vector<2x1024xf32> -> vector<2x1024xf32>
    %c0_10 = arith.constant 0 : index
    %c0_11 = arith.constant 0 : index
    %12 = vector.load %arg5[%c0_10, %c0_11] : memref<2x1024xf32, #tpu.memory_space<vmem>>, vector<2x1024xf32>
    tpu.vector_store %arg5[%c0_10, %c0_11], %11 {strides = array<i32>} : memref<2x1024xf32, #tpu.memory_space<vmem>>, vector<2x1024xf32>,
    return
  }
}

module attributes {stable_mosaic.version = 11 : i64} {
  func.func @_bn_relu_convT_kernel(%arg0: memref<64x86xf32, #tpu.memory_space<vmem>>, %arg1: memref<1x86xf32, #tpu.memory_space<vmem>>, %arg2: memref<64x1xf32, #tpu.memory_space<vmem>>, %arg3: memref<64x1xf32, #tpu.memory_space<vmem>>, %arg4: memref<128x256xbf16, #tpu.memory_space<vmem>>, %arg5: memref<128x79xf32, #tpu.memory_space<vmem>>, %arg6: memref<64x86xf32, #tpu.memory_space<vmem>>) attributes {dimension_semantics = [], scalar_prefetch = 0 : i64, scratch_operands = 1 : i64, tpu.core_type = #tpu.core_type<tc>} {
    %c0 = arith.constant 0 : index
    %c0_0 = arith.constant 0 : index
    %0 = vector.load %arg0[%c0, %c0_0] : memref<64x86xf32, #tpu.memory_space<vmem>>, vector<64x86xf32>
    %c0_1 = arith.constant 0 : index
    %c0_2 = arith.constant 0 : index
    %1 = vector.load %arg1[%c0_1, %c0_2] : memref<1x86xf32, #tpu.memory_space<vmem>>, vector<1x86xf32>
    %2 = vector.broadcast %1 : vector<1x86xf32> to vector<64x86xf32>
    %3 = arith.mulf %0, %2 : vector<64x86xf32>
    %cst = arith.constant dense<0.000000e+00> : vector<64xf32>
    %4 = vector.multi_reduction <add>, %3, %cst [1] : vector<64x86xf32> to vector<64xf32>
    %5 = vector.shape_cast %4 : vector<64xf32> to vector<64x1xf32>
    %6 = arith.mulf %3, %0 : vector<64x86xf32>
    %cst_3 = arith.constant dense<0.000000e+00> : vector<64xf32>
    %7 = vector.multi_reduction <add>, %6, %cst_3 [1] : vector<64x86xf32> to vector<64xf32>
    %8 = vector.shape_cast %7 : vector<64xf32> to vector<64x1xf32>
    %cst_4 = arith.constant 3.125000e-02 : f32
    %9 = vector.broadcast %cst_4 : f32 to vector<64x1xf32>
    %10 = arith.mulf %5, %9 : vector<64x1xf32>
    %cst_5 = arith.constant 3.125000e-02 : f32
    %11 = vector.broadcast %cst_5 : f32 to vector<64x1xf32>
    %12 = arith.mulf %8, %11 : vector<64x1xf32>
    %13 = arith.mulf %10, %10 : vector<64x1xf32>
    %14 = arith.subf %12, %13 : vector<64x1xf32>
    %15 = vector.broadcast %10 : vector<64x1xf32> to vector<64x86xf32>
    %16 = arith.subf %0, %15 : vector<64x86xf32>
    %cst_6 = arith.constant 9.99999974E-6 : f32
    %17 = vector.broadcast %cst_6 : f32 to vector<64x1xf32>
    %18 = arith.addf %14, %17 : vector<64x1xf32>
    %19 = math.rsqrt %18 : vector<64x1xf32>
    %20 = vector.broadcast %19 : vector<64x1xf32> to vector<64x86xf32>
    %21 = arith.mulf %16, %20 : vector<64x86xf32>
    %c0_7 = arith.constant 0 : index
    %c0_8 = arith.constant 0 : index
    %22 = vector.load %arg2[%c0_7, %c0_8] : memref<64x1xf32, #tpu.memory_space<vmem>>, vector<64x1xf32>
    %23 = vector.broadcast %22 : vector<64x1xf32> to vector<64x86xf32>
    %24 = arith.mulf %21, %23 : vector<64x86xf32>
    %c0_9 = arith.constant 0 : index
    %c0_10 = arith.constant 0 : index
    %25 = vector.load %arg3[%c0_9, %c0_10] : memref<64x1xf32, #tpu.memory_space<vmem>>, vector<64x1xf32>
    %26 = vector.broadcast %25 : vector<64x1xf32> to vector<64x86xf32>
    %27 = arith.addf %24, %26 : vector<64x86xf32>
    %cst_11 = arith.constant 0.000000e+00 : f32
    %28 = vector.broadcast %cst_11 : f32 to vector<64x86xf32>
    %29 = arith.maximumf %27, %28 : vector<64x86xf32>
    %30 = vector.broadcast %1 : vector<1x86xf32> to vector<64x86xf32>
    %31 = arith.mulf %29, %30 : vector<64x86xf32>
    %c0_12 = arith.constant 0 : index
    %c0_13 = arith.constant 0 : index
    %32 = vector.load %arg6[%c0_12, %c0_13] : memref<64x86xf32, #tpu.memory_space<vmem>>, vector<64x86xf32>
    tpu.vector_store %arg6[%c0_12, %c0_13], %31 {strides = array<i32>} : memref<64x86xf32, #tpu.memory_space<vmem>>, vector<64x86xf32>,
    %c0_14 = arith.constant 0 : index
    %c0_15 = arith.constant 0 : index
    %33 = vector.load %arg6[%c0_14, %c0_15] : memref<64x86xf32, #tpu.memory_space<vmem>>, vector<64x79xf32>
    %c0_16 = arith.constant 0 : index
    %c1 = arith.constant 1 : index
    %34 = vector.load %arg6[%c0_16, %c1] : memref<64x86xf32, #tpu.memory_space<vmem>>, vector<64x79xf32>
    %c0_17 = arith.constant 0 : index
    %c6 = arith.constant 6 : index
    %35 = vector.load %arg6[%c0_17, %c6] : memref<64x86xf32, #tpu.memory_space<vmem>>, vector<64x79xf32>
    %c0_18 = arith.constant 0 : index
    %c7 = arith.constant 7 : index
    %36 = vector.load %arg6[%c0_18, %c7] : memref<64x86xf32, #tpu.memory_space<vmem>>, vector<64x79xf32>
    %37 = tpu.concatenate %33, %34, %35, %36 in 0 : vector<64x79xf32>, vector<64x79xf32>, vector<64x79xf32>, vector<64x79xf32> -> vector<256x79xf32>
    %c0_19 = arith.constant 0 : index
    %c0_20 = arith.constant 0 : index
    %38 = vector.load %arg4[%c0_19, %c0_20] : memref<128x256xbf16, #tpu.memory_space<vmem>>, vector<128x256xbf16>
    %39 = arith.truncf %37 : vector<256x79xf32> to vector<256x79xbf16>
    %cst_21 = arith.constant dense<0.000000e+00> : vector<128x79xf32>
    %40 = tpu.matmul %38, %39, %cst_21 {dimension_numbers = #tpu.dot_dimension_numbers<[1], [0], [0], [1], [0, 0, 1, 1], [], []>} : vector<128x256xbf16>, vector<256x79xbf16>, vector<128x79xf32> -> vector<128x79xf32>
    %c0_22 = arith.constant 0 : index
    %c0_23 = arith.constant 0 : index
    %41 = vector.load %arg5[%c0_22, %c0_23] : memref<128x79xf32, #tpu.memory_space<vmem>>, vector<128x79xf32>
    tpu.vector_store %arg5[%c0_22, %c0_23], %40 {strides = array<i32>} : memref<128x79xf32, #tpu.memory_space<vmem>>, vector<128x79xf32>,
    return
  }
}

module attributes {stable_mosaic.version = 11 : i64} {
  func.func @_bn_relu_convT_kernel(%arg0: memref<32x222xf32, #tpu.memory_space<vmem>>, %arg1: memref<1x222xf32, #tpu.memory_space<vmem>>, %arg2: memref<32x1xf32, #tpu.memory_space<vmem>>, %arg3: memref<32x1xf32, #tpu.memory_space<vmem>>, %arg4: memref<64x128xbf16, #tpu.memory_space<vmem>>, %arg5: memref<64x211xf32, #tpu.memory_space<vmem>>, %arg6: memref<32x222xf32, #tpu.memory_space<vmem>>) attributes {dimension_semantics = [], scalar_prefetch = 0 : i64, scratch_operands = 1 : i64, tpu.core_type = #tpu.core_type<tc>} {
    %c0 = arith.constant 0 : index
    %c0_0 = arith.constant 0 : index
    %0 = vector.load %arg0[%c0, %c0_0] : memref<32x222xf32, #tpu.memory_space<vmem>>, vector<32x222xf32>
    %c0_1 = arith.constant 0 : index
    %c0_2 = arith.constant 0 : index
    %1 = vector.load %arg1[%c0_1, %c0_2] : memref<1x222xf32, #tpu.memory_space<vmem>>, vector<1x222xf32>
    %2 = vector.broadcast %1 : vector<1x222xf32> to vector<32x222xf32>
    %3 = arith.mulf %0, %2 : vector<32x222xf32>
    %cst = arith.constant dense<0.000000e+00> : vector<32xf32>
    %4 = vector.multi_reduction <add>, %3, %cst [1] : vector<32x222xf32> to vector<32xf32>
    %5 = vector.shape_cast %4 : vector<32xf32> to vector<32x1xf32>
    %6 = arith.mulf %3, %0 : vector<32x222xf32>
    %cst_3 = arith.constant dense<0.000000e+00> : vector<32xf32>
    %7 = vector.multi_reduction <add>, %6, %cst_3 [1] : vector<32x222xf32> to vector<32xf32>
    %8 = vector.shape_cast %7 : vector<32xf32> to vector<32x1xf32>
    %cst_4 = arith.constant 7.812500e-03 : f32
    %9 = vector.broadcast %cst_4 : f32 to vector<32x1xf32>
    %10 = arith.mulf %5, %9 : vector<32x1xf32>
    %cst_5 = arith.constant 7.812500e-03 : f32
    %11 = vector.broadcast %cst_5 : f32 to vector<32x1xf32>
    %12 = arith.mulf %8, %11 : vector<32x1xf32>
    %13 = arith.mulf %10, %10 : vector<32x1xf32>
    %14 = arith.subf %12, %13 : vector<32x1xf32>
    %15 = vector.broadcast %10 : vector<32x1xf32> to vector<32x222xf32>
    %16 = arith.subf %0, %15 : vector<32x222xf32>
    %cst_6 = arith.constant 9.99999974E-6 : f32
    %17 = vector.broadcast %cst_6 : f32 to vector<32x1xf32>
    %18 = arith.addf %14, %17 : vector<32x1xf32>
    %19 = math.rsqrt %18 : vector<32x1xf32>
    %20 = vector.broadcast %19 : vector<32x1xf32> to vector<32x222xf32>
    %21 = arith.mulf %16, %20 : vector<32x222xf32>
    %c0_7 = arith.constant 0 : index
    %c0_8 = arith.constant 0 : index
    %22 = vector.load %arg2[%c0_7, %c0_8] : memref<32x1xf32, #tpu.memory_space<vmem>>, vector<32x1xf32>
    %23 = vector.broadcast %22 : vector<32x1xf32> to vector<32x222xf32>
    %24 = arith.mulf %21, %23 : vector<32x222xf32>
    %c0_9 = arith.constant 0 : index
    %c0_10 = arith.constant 0 : index
    %25 = vector.load %arg3[%c0_9, %c0_10] : memref<32x1xf32, #tpu.memory_space<vmem>>, vector<32x1xf32>
    %26 = vector.broadcast %25 : vector<32x1xf32> to vector<32x222xf32>
    %27 = arith.addf %24, %26 : vector<32x222xf32>
    %cst_11 = arith.constant 0.000000e+00 : f32
    %28 = vector.broadcast %cst_11 : f32 to vector<32x222xf32>
    %29 = arith.maximumf %27, %28 : vector<32x222xf32>
    %30 = vector.broadcast %1 : vector<1x222xf32> to vector<32x222xf32>
    %31 = arith.mulf %29, %30 : vector<32x222xf32>
    %c0_12 = arith.constant 0 : index
    %c0_13 = arith.constant 0 : index
    %32 = vector.load %arg6[%c0_12, %c0_13] : memref<32x222xf32, #tpu.memory_space<vmem>>, vector<32x222xf32>
    tpu.vector_store %arg6[%c0_12, %c0_13], %31 {strides = array<i32>} : memref<32x222xf32, #tpu.memory_space<vmem>>, vector<32x222xf32>,
    %c0_14 = arith.constant 0 : index
    %c0_15 = arith.constant 0 : index
    %33 = vector.load %arg6[%c0_14, %c0_15] : memref<32x222xf32, #tpu.memory_space<vmem>>, vector<32x211xf32>
    %c0_16 = arith.constant 0 : index
    %c1 = arith.constant 1 : index
    %34 = vector.load %arg6[%c0_16, %c1] : memref<32x222xf32, #tpu.memory_space<vmem>>, vector<32x211xf32>
    %c0_17 = arith.constant 0 : index
    %c10 = arith.constant 10 : index
    %35 = vector.load %arg6[%c0_17, %c10] : memref<32x222xf32, #tpu.memory_space<vmem>>, vector<32x211xf32>
    %c0_18 = arith.constant 0 : index
    %c11 = arith.constant 11 : index
    %36 = vector.load %arg6[%c0_18, %c11] : memref<32x222xf32, #tpu.memory_space<vmem>>, vector<32x211xf32>
    %37 = tpu.concatenate %33, %34, %35, %36 in 0 : vector<32x211xf32>, vector<32x211xf32>, vector<32x211xf32>, vector<32x211xf32> -> vector<128x211xf32>
    %c0_19 = arith.constant 0 : index
    %c0_20 = arith.constant 0 : index
    %38 = vector.load %arg4[%c0_19, %c0_20] : memref<64x128xbf16, #tpu.memory_space<vmem>>, vector<64x128xbf16>
    %39 = arith.truncf %37 : vector<128x211xf32> to vector<128x211xbf16>
    %cst_21 = arith.constant dense<0.000000e+00> : vector<64x211xf32>
    %40 = tpu.matmul %38, %39, %cst_21 {dimension_numbers = #tpu.dot_dimension_numbers<[1], [0], [0], [1], [0, 0, 1, 1], [], []>} : vector<64x128xbf16>, vector<128x211xbf16>, vector<64x211xf32> -> vector<64x211xf32>
    %c0_22 = arith.constant 0 : index
    %c0_23 = arith.constant 0 : index
    %41 = vector.load %arg5[%c0_22, %c0_23] : memref<64x211xf32, #tpu.memory_space<vmem>>, vector<64x211xf32>
    tpu.vector_store %arg5[%c0_22, %c0_23], %40 {strides = array<i32>} : memref<64x211xf32, #tpu.memory_space<vmem>>, vector<64x211xf32>,
    return
  }
}

module attributes {stable_mosaic.version = 11 : i64} {
  func.func @_bn_relu_convT_kernel(%arg0: memref<16x546xf32, #tpu.memory_space<vmem>>, %arg1: memref<1x546xf32, #tpu.memory_space<vmem>>, %arg2: memref<16x1xf32, #tpu.memory_space<vmem>>, %arg3: memref<16x1xf32, #tpu.memory_space<vmem>>, %arg4: memref<4x64xbf16, #tpu.memory_space<vmem>>, %arg5: memref<4x529xf32, #tpu.memory_space<vmem>>, %arg6: memref<16x546xf32, #tpu.memory_space<vmem>>) attributes {dimension_semantics = [], scalar_prefetch = 0 : i64, scratch_operands = 1 : i64, tpu.core_type = #tpu.core_type<tc>} {
    %c0 = arith.constant 0 : index
    %c0_0 = arith.constant 0 : index
    %0 = vector.load %arg0[%c0, %c0_0] : memref<16x546xf32, #tpu.memory_space<vmem>>, vector<16x546xf32>
    %c0_1 = arith.constant 0 : index
    %c0_2 = arith.constant 0 : index
    %1 = vector.load %arg1[%c0_1, %c0_2] : memref<1x546xf32, #tpu.memory_space<vmem>>, vector<1x546xf32>
    %2 = vector.broadcast %1 : vector<1x546xf32> to vector<16x546xf32>
    %3 = arith.mulf %0, %2 : vector<16x546xf32>
    %cst = arith.constant dense<0.000000e+00> : vector<16xf32>
    %4 = vector.multi_reduction <add>, %3, %cst [1] : vector<16x546xf32> to vector<16xf32>
    %5 = vector.shape_cast %4 : vector<16xf32> to vector<16x1xf32>
    %6 = arith.mulf %3, %0 : vector<16x546xf32>
    %cst_3 = arith.constant dense<0.000000e+00> : vector<16xf32>
    %7 = vector.multi_reduction <add>, %6, %cst_3 [1] : vector<16x546xf32> to vector<16xf32>
    %8 = vector.shape_cast %7 : vector<16xf32> to vector<16x1xf32>
    %cst_4 = arith.constant 0.001953125 : f32
    %9 = vector.broadcast %cst_4 : f32 to vector<16x1xf32>
    %10 = arith.mulf %5, %9 : vector<16x1xf32>
    %cst_5 = arith.constant 0.001953125 : f32
    %11 = vector.broadcast %cst_5 : f32 to vector<16x1xf32>
    %12 = arith.mulf %8, %11 : vector<16x1xf32>
    %13 = arith.mulf %10, %10 : vector<16x1xf32>
    %14 = arith.subf %12, %13 : vector<16x1xf32>
    %15 = vector.broadcast %10 : vector<16x1xf32> to vector<16x546xf32>
    %16 = arith.subf %0, %15 : vector<16x546xf32>
    %cst_6 = arith.constant 9.99999974E-6 : f32
    %17 = vector.broadcast %cst_6 : f32 to vector<16x1xf32>
    %18 = arith.addf %14, %17 : vector<16x1xf32>
    %19 = math.rsqrt %18 : vector<16x1xf32>
    %20 = vector.broadcast %19 : vector<16x1xf32> to vector<16x546xf32>
    %21 = arith.mulf %16, %20 : vector<16x546xf32>
    %c0_7 = arith.constant 0 : index
    %c0_8 = arith.constant 0 : index
    %22 = vector.load %arg2[%c0_7, %c0_8] : memref<16x1xf32, #tpu.memory_space<vmem>>, vector<16x1xf32>
    %23 = vector.broadcast %22 : vector<16x1xf32> to vector<16x546xf32>
    %24 = arith.mulf %21, %23 : vector<16x546xf32>
    %c0_9 = arith.constant 0 : index
    %c0_10 = arith.constant 0 : index
    %25 = vector.load %arg3[%c0_9, %c0_10] : memref<16x1xf32, #tpu.memory_space<vmem>>, vector<16x1xf32>
    %26 = vector.broadcast %25 : vector<16x1xf32> to vector<16x546xf32>
    %27 = arith.addf %24, %26 : vector<16x546xf32>
    %cst_11 = arith.constant 0.000000e+00 : f32
    %28 = vector.broadcast %cst_11 : f32 to vector<16x546xf32>
    %29 = arith.maximumf %27, %28 : vector<16x546xf32>
    %30 = vector.broadcast %1 : vector<1x546xf32> to vector<16x546xf32>
    %31 = arith.mulf %29, %30 : vector<16x546xf32>
    %c0_12 = arith.constant 0 : index
    %c0_13 = arith.constant 0 : index
    %32 = vector.load %arg6[%c0_12, %c0_13] : memref<16x546xf32, #tpu.memory_space<vmem>>, vector<16x546xf32>
    tpu.vector_store %arg6[%c0_12, %c0_13], %31 {strides = array<i32>} : memref<16x546xf32, #tpu.memory_space<vmem>>, vector<16x546xf32>,
    %c0_14 = arith.constant 0 : index
    %c0_15 = arith.constant 0 : index
    %33 = vector.load %arg6[%c0_14, %c0_15] : memref<16x546xf32, #tpu.memory_space<vmem>>, vector<16x529xf32>
    %c0_16 = arith.constant 0 : index
    %c1 = arith.constant 1 : index
    %34 = vector.load %arg6[%c0_16, %c1] : memref<16x546xf32, #tpu.memory_space<vmem>>, vector<16x529xf32>
    %c0_17 = arith.constant 0 : index
    %c16 = arith.constant 16 : index
    %35 = vector.load %arg6[%c0_17, %c16] : memref<16x546xf32, #tpu.memory_space<vmem>>, vector<16x529xf32>
    %c0_18 = arith.constant 0 : index
    %c17 = arith.constant 17 : index
    %36 = vector.load %arg6[%c0_18, %c17] : memref<16x546xf32, #tpu.memory_space<vmem>>, vector<16x529xf32>
    %37 = tpu.concatenate %33, %34, %35, %36 in 0 : vector<16x529xf32>, vector<16x529xf32>, vector<16x529xf32>, vector<16x529xf32> -> vector<64x529xf32>
    %c0_19 = arith.constant 0 : index
    %c0_20 = arith.constant 0 : index
    %38 = vector.load %arg4[%c0_19, %c0_20] : memref<4x64xbf16, #tpu.memory_space<vmem>>, vector<4x64xbf16>
    %39 = arith.truncf %37 : vector<64x529xf32> to vector<64x529xbf16>
    %cst_21 = arith.constant dense<0.000000e+00> : vector<4x529xf32>
    %40 = tpu.matmul %38, %39, %cst_21 {dimension_numbers = #tpu.dot_dimension_numbers<[1], [0], [0], [1], [0, 0, 1, 1], [], []>} : vector<4x64xbf16>, vector<64x529xbf16>, vector<4x529xf32> -> vector<4x529xf32>
    %41 = math.tanh %40 : vector<4x529xf32>
    %c0_22 = arith.constant 0 : index
    %c0_23 = arith.constant 0 : index
    %42 = vector.load %arg5[%c0_22, %c0_23] : memref<4x529xf32, #tpu.memory_space<vmem>>, vector<4x529xf32>
    tpu.vector_store %arg5[%c0_22, %c0_23], %41 {strides = array<i32>} : memref<4x529xf32, #tpu.memory_space<vmem>>, vector<4x529xf32>,
    return
  }
}

</mosaic_0001>

<bundles_post_ra>
// kernel: generator_forward.4
= control target key start
LH: loop header
LB: loop body
LE: loop exit
PB: predicated region body
PF: predicated region fallthrough
CT: control target
= control target key end

     0   :  { %11 = vsyncpa [#allocation4], 0  ;;  %s746_s0 = inlined_call_operand.vmem [shape: f32[2,32], index: 0, kind: input, shape index: {}]   ;;  %s747_s1 = inlined_call_operand.vmem [shape: f32[32,32], index: 1, kind: input, shape index: {}]   ;;  %s748_s2 = inlined_call_operand.hbm [shape: f32[32,32], index: 2, kind: input, shape index: {}]   ;;  %s749_s3 = inlined_call_operand.hbm [shape: bf16[32,1024], index: 3, kind: input, shape index: {}]   ;;  %s750_s4 = inlined_call_operand.<no memory space> [shape: f32[1], index: 4, kind: input, shape index: {}]   ;;  %s751_s5 = inlined_call_operand.vmem [shape: f32[2,1024], index: 5, kind: output, shape index: {}]  }
   0x1   :  { %12 = vsyncpa [#allocation6], 0  ;;  %s651_s18 = smov [#allocation3]   ;;  %s603_s22 = scalar_lea.hbm %s748_s2, 512 }
   0x2   :  { %s22_s19 = sshll.u32 %s651_s18, 4  ;;  %p604_p0 = scmp.ne.s32.totalorder %s748_s2, %s603_s22  ;;  %s23_s19 = int_to_ptr.vmem [resolvable:$true] %s22_s19 }
   0x3   :  { %p607_p1 = scmp.lt.u32.totalorder %s603_s22, %s748_s2 }
   0x5   :  { %p609_p2 = pnand %p607_p1, %p604_p0 }
   0x7   :  { %612 = shalt.err (!%p609_p2)
}
   0x8   :  { %s613_s27 = scalar_lea.vmem %s23_s19, 512  ;;  %p618_p4 = scmp.lt.s32.totalorder %s23_s19, %s23_s19 }
   0x9   :  { %p614_p3 = scmp.ne.s32.totalorder %s23_s19, %s613_s27  ;;  %p619_p5 = scmp.lt.s32.totalorder %s613_s27, %s613_s27 }
   0xb   :  { %p620_p6 = por %p619_p5, %p618_p4 }
   0xd   :  { %p621_p7 = pnand %p620_p6, %p614_p3 }
   0xf   :  { %624 = shalt.err (!%p621_p7)
}
  0x10   :  { %s652_s28 = smov 128   ;;  %s653_s29 = smov 8  }
  0x11   :  { %28 = dma.hbm_to_vmem [thread:$0]  %s748_s2, 512, %s23_s19, [#allocation4], %s652_s28, %s652_s28, %s653_s29  }
  0x12   :  { %s654_s7 = smov [#allocation5]   ;;  %s625_s11 = scalar_lea.hbm %s749_s3, 2048 }
  0x13   :  { %s34_s8 = sshll.u32 %s654_s7, 4  ;;  %p626_p8 = scmp.ne.s32.totalorder %s749_s3, %s625_s11  ;;  %s35_s8 = int_to_ptr.vmem [resolvable:$true] %s34_s8 }
  0x14   :  { %p629_p9 = scmp.lt.u32.totalorder %s625_s11, %s749_s3 }
  0x16   :  { %p631_p10 = pnand %p629_p9, %p626_p8 }
  0x18   :  { %634 = shalt.err (!%p631_p10)
}
  0x19   :  { %s635_s16 = scalar_lea.vmem %s35_s8, 2048  ;;  %p640_p12 = scmp.lt.s32.totalorder %s35_s8, %s35_s8 }
  0x1a   :  { %p636_p11 = scmp.ne.s32.totalorder %s35_s8, %s635_s16  ;;  %p641_p13 = scmp.lt.s32.totalorder %s635_s16, %s635_s16 }
  0x1c   :  { %p642_p0 = por %p641_p13, %p640_p12 }
  0x1e   :  { %p643_p1 = pnand %p642_p0, %p636_p11 }
  0x20   :  { %646 = shalt.err (!%p643_p1)
}
  0x21   :  { %s655_s2 = smov 512   ;;  %s656_s17 = smov 32  }
  0x22   :  { %40 = dma.hbm_to_vmem [thread:$0]  %s749_s3, 2048, %s35_s8, [#allocation6], %s655_s2, %s655_s2, %s656_s17  }
  0x23   :  { %647 = dma.done.wait [#allocation4], 512  }
  0x24   :  { %648 = vsyncadd [#allocation4], 4294966784 }
  0x25   :  { %649 = dma.done.wait [#allocation6], 2048  }
  0x26   :  { %650 = vsyncadd [#allocation6], 4294965248  ;;  %v657_v0 = vmov 0.0|0.0   ;;  %vm658_vm0 = vmmov 0   ;;  %v659_v1 = vmov 0.0   ;;  %v51_v2 = vld [vmem:[%s747_s1] sm:$0xff]  ;;  %v207_v42 = vstv %s750_s4 }
  0x27   :  { %580 = vmatprep.subr.bf16.mxu0 %v657_v0  ;;  %566 = vmatprep.mubr.msk.f32.mxu0 %vm658_vm0, %v659_v1  ;;  %v52_v3 = vld [vmem:[%s747_s1 + $0x8] sm:$0xff]  ;;  %v53_v4 = vld [vmem:[%s747_s1 + $0x10] sm:$0xff]  ;;  %v54_v6 = vld [vmem:[%s747_s1 + $0x18] sm:$0xff]  ;;  %vm55_vm1 = vcmask 261120   ;;  %v660_v39 = vmov 0   ;;  %v487_v58 = vlaneseq }
  0x28   :  { %586 = vmatprep.subr.bf16.mxu1 %v657_v0  ;;  %577 = vmatprep.mubr.msk.f32.mxu1 %vm658_vm0, %v659_v1  ;;  %v581_v5 = vpack.c.bf16 %v52_v3, %v51_v2  ;;  %v129_v7 = vld [vmem:[#allocation3] sm:$0xff]  ;;  %v130_v8 = vld [vmem:[#allocation3 + $0x8] sm:$0xff]  ;;  %v131_v9 = vld [vmem:[#allocation3 + $0x10] sm:$0xff]  ;;  %v584_v11 = vpack.c.bf16 %v54_v6, %v53_v4  ;;  %v661_v56 = vmov 1983009808  }
  0x29   :  { %v132_v10 = vld [vmem:[#allocation3 + $0x18] sm:$0xff]  ;;  %v587_v12 = vpack.c.bf16 %v130_v8, %v129_v7  ;;  %v50_v14 = vld [vmem:[%s746_s0] sm:$0x3]  ;;  %v212_v17 = vld [vmem:[#allocation5 + $0x8] sm:$0xff]  ;;  %v485_v57 = vunpack.c.l.s4 %v661_v56  ;;  %v488_v60 = vshrl.u32 %v487_v58, 7 }
  0x2a   :  { %582 = vmatpush3.bf16.msra.mxu0 %v581_v5  ;;  %v590_v13 = vpack.c.bf16 %v132_v10, %v131_v9  ;;  %v211_v15 = vld [vmem:[#allocation5] sm:$0xff]  ;;  %v216_v20 = vld [vmem:[#allocation5 + $0x28] sm:$0xff]  ;;  %v213_v33 = vld [vmem:[#allocation5 + $0x10] sm:$0xff] }
  0x2b   :  { %583 = vmatprep.subr.bf16.mxu0 %v657_v0  ;;  %588 = vmatpush3.bf16.msra.mxu1 %v587_v12  ;;  %v215_v16 = vld [vmem:[#allocation5 + $0x20] sm:$0xff]  ;;  %v530_v21 = vcombine.low %v212_v17, %v216_v20  ;;  %v531_v22 = vcombine.high %v212_v17, %v216_v20  ;;  %v220_v27 = vld [vmem:[#allocation5 + $0x48] sm:$0xff]  ;;  %v217_v34 = vld [vmem:[#allocation5 + $0x30] sm:$0xff]  ;;  %v486_v59 = vunpack.c.0.s8 %v485_v57 }
  0x2c   :  { %589 = vmatprep.subr.bf16.mxu1 %v657_v0  ;;  %v528_v18 = vcombine.low %v211_v15, %v215_v16  ;;  %v529_v19 = vcombine.high %v211_v15, %v215_v16  ;;  %v219_v25 = vld [vmem:[#allocation5 + $0x40] sm:$0xff]  ;;  %v224_v29 = vld [vmem:[#allocation5 + $0x68] sm:$0xff]  ;;  %v214_v35 = vld [vmem:[#allocation5 + $0x18] sm:$0xff]  ;;  %v532_v36 = vcombine.low %v213_v33, %v217_v34  ;;  %v533_v37 = vcombine.high %v213_v33, %v217_v34 }
  0x2d   :  { %v223_v26 = vld [vmem:[#allocation5 + $0x60] sm:$0xff]  ;;  %v538_v31 = vcombine.low %v220_v27, %v224_v29  ;;  %v539_v32 = vcombine.high %v220_v27, %v224_v29  ;;  %v218_v38 = vld [vmem:[#allocation5 + $0x38] sm:$0xff]  ;;  %v221_v46 = vld [vmem:[#allocation5 + $0x50] sm:$0xff]  ;;  %v489_v63 = vsub.s32 %v486_v59, %v488_v60 }
  0x2e   :  { %585 = vmatpush3.bf16.msra.mxu0 %v584_v11  ;;  %v537_v28 = vcombine.high %v219_v25, %v223_v26  ;;  %v536_v30 = vcombine.low %v219_v25, %v223_v26  ;;  %v534_v40 = vcombine.low %v214_v35, %v218_v38  ;;  %v535_v41 = vcombine.high %v214_v35, %v218_v38  ;;  %v225_v47 = vld [vmem:[#allocation5 + $0x70] sm:$0xff]  ;;  %v222_v48 = vld [vmem:[#allocation5 + $0x58] sm:$0xff] }
  0x2f   :  { %591 = vmatpush3.bf16.msra.mxu1 %v590_v13  ;;  %310 = vmatprep.subr.bf16.mxu0 %v529_v19  ;;  %v226_v49 = vld [vmem:[#allocation5 + $0x78] sm:$0xff]  ;;  %v541_v52 = vcombine.high %v221_v46, %v225_v47  ;;  %v540_v54 = vcombine.low %v221_v46, %v225_v47 }
  0x30   :  { %351 = vmatprep.subr.bf16.mxu1 %v531_v22  ;;  %v543_v53 = vcombine.high %v222_v48, %v226_v49  ;;  %v542_v55 = vcombine.low %v222_v48, %v226_v49 }
  0x31   :  { %567 = vmatmul.mubr.msk.f32.vlgmr.msra.gmra.mrb[0].mxu0 %vm55_vm1, %v50_v14 }
  0x32   :  { %311 = vmatpush1.bf16.msra.mxu0 %v528_v18  ;;  %342 = vmatprep.mubr.bf16.mxu0 %v660_v39 }
  0x33   :  { %312 = vmatprep.subr.bf16.mxu0 %v537_v28 }
  0x36   :  { %313 = vmatpush1.bf16.msra.mxu0 %v536_v30 }
  0x37   :  { %392 = vmatprep.subr.bf16.mxu0 %v533_v37 }
 0x104   :  { %v125_v23 = vpop.f32.mrb[0].mxu0 }
 0x105   :  { %v568_v24 = vpop.f32.mrb[1].mxu0  ;;  %578 = vmatmul.mubr.msk.f32.vlgmr.msra.gmra.mrb[0].mxu1 %vm55_vm1, %v125_v23 }
 0x106   :  { %352 = vmatpush1.bf16.msra.mxu1 %v530_v21  ;;  %383 = vmatprep.mubr.bf16.mxu1 %v660_v39 }
 0x107   :  { %353 = vmatprep.subr.bf16.mxu1 %v539_v32 }
 0x10a   :  { %354 = vmatpush1.bf16.msra.mxu1 %v538_v31 }
 0x10b   :  { %433 = vmatprep.subr.bf16.mxu1 %v535_v41 }
 0x1d8   :  { %v202_v43 = vpop.f32.mrb[0].mxu1 }
 0x1d9   :  { %v208_v44 = vmul.f32 %v207_v42, %v202_v43  ;;  %v579_v45 = vpop.f32.mrb[1].mxu1 }
 0x1db   :  { %v209_v50 = vadd.f32 %v208_v44, %v50_v14 }
 0x1dd   :  { %v210_v51 = vpack.c.bf16 %v209_v50, %v209_v50 }
 0x1df   :  { %544 = vmatmul.mubr.msk.bf16.vlgmr.msra.gmra.mrb[4].mxu0 %vm55_vm1, %v210_v51  ;;  %545 = vmatmul.mubr.msk.bf16.vlgmr.msra.gmra.mrb[4].mxu1 %vm55_vm1, %v210_v51 }
 0x1e0   :  { %393 = vmatpush1.bf16.msra.mxu0 %v532_v36  ;;  %434 = vmatpush1.bf16.msra.mxu1 %v534_v40 }
 0x1e1   :  { %394 = vmatprep.subr.bf16.mxu0 %v541_v52  ;;  %435 = vmatprep.subr.bf16.mxu1 %v543_v53 }
 0x1e2   :  { %424 = vmatprep.mubr.bf16.mxu0 %v660_v39  ;;  %465 = vmatprep.mubr.bf16.mxu1 %v660_v39 }
 0x1e4   :  { %395 = vmatpush1.bf16.msra.mxu0 %v540_v54  ;;  %436 = vmatpush1.bf16.msra.mxu1 %v542_v55 }
 0x1e7   :  { %546 = vmatmul.mubr.msk.bf16.vlgmr.msra.gmra.mrb[8].mxu0 %vm55_vm1, %v210_v51  ;;  %547 = vmatmul.mubr.msk.bf16.vlgmr.msra.gmra.mrb[8].mxu1 %vm55_vm1, %v210_v51 }
 0x2b2   :  { %v344_v61 = vpop.f32.mrb[4].mxu0  ;;  %v385_v62 = vpop.f32.mrb[4].mxu1 }
 0x2b3   :  { %v346_v0 = vpop.f32.mrb[5].mxu0  ;;  %v387_v1 = vpop.f32.mrb[5].mxu1 }
 0x2b4   :  { %v482_v2 = vcombine.low %v344_v61, %v346_v0  ;;  %v483_v3 = vcombine.low %v385_v62, %v387_v1  ;;  %v348_v4 = vpop.f32.mrb[6].mxu0  ;;  %v389_v5 = vpop.f32.mrb[6].mxu1 }
 0x2b5   :  { %v349_v6 = vpop.f32.mrb[7].mxu0  ;;  %v390_v7 = vpop.f32.mrb[7].mxu1 }
 0x2b6   :  { %v490_v8 = vrot.slane %v482_v2, %v489_v63  ;;  %v497_v9 = vrot.slane %v483_v3, %v489_v63 }
 0x2b8   :  { %v498_v10 = vcombine.low %v490_v8, %v497_v9 }
 0x2ba   :  { %518 = vst [vmem:[%s751_s5] sm:$0xff] %v498_v10  ;;  %v426_v11 = vpop.f32.mrb[8].mxu0  ;;  %v467_v12 = vpop.f32.mrb[8].mxu1 }
 0x2bb   :  { %v428_v13 = vpop.f32.mrb[9].mxu0  ;;  %v469_v14 = vpop.f32.mrb[9].mxu1 }
 0x2bc   :  { %v499_v15 = vcombine.low %v426_v11, %v428_v13  ;;  %v500_v16 = vcombine.low %v467_v12, %v469_v14  ;;  %v430_v17 = vpop.f32.mrb[10].mxu0  ;;  %v471_v18 = vpop.f32.mrb[10].mxu1 }
 0x2bd   :  { %v431_v19 = vpop.f32.mrb[11].mxu0  ;;  %v472_v20 = vpop.f32.mrb[11].mxu1 }
 0x2be   :  { %v507_v21 = vrot.slane %v499_v15, %v489_v63  ;;  %v514_v22 = vrot.slane %v500_v16, %v489_v63 }
 0x2c0   :  { %v515_v23 = vcombine.low %v507_v21, %v514_v22 }
 0x2c2   :  { %519 = vst [vmem:[%s751_s5 + $0x8] sm:$0xff] %v515_v23 }
 0x2c3   :  { %524 = vsyncpa [#allocation4], 1 }
 0x2c4   :  { %525 = vsyncpa [#allocation6], 1 }

// kernel: generator_forward.5
= control target key start
LH: loop header
LB: loop body
LE: loop exit
PB: predicated region body
PF: predicated region fallthrough
CT: control target
= control target key end

     0   :  { %vm44_vm0 = vcmask 703488   ;;  %v822_v3 = vmov 0   ;;  %s825_s14 = smov 127   ;;  %vm598_vm1 = vcmask 646144   ;;  %s1153_s0 = inlined_call_operand.vmem [shape: f32[64,86], index: 0, kind: input, shape index: {}]   ;;  %s1154_s1 = inlined_call_operand.vmem [shape: f32[1,86], index: 1, kind: input, shape index: {}]   ;;  %s1155_s2 = inlined_call_operand.vmem [shape: f32[64,1], index: 2, kind: input, shape index: {}]   ;;  %s1156_s3 = inlined_call_operand.vmem [shape: f32[64,1], index: 3, kind: input, shape index: {}]   ;;  %s1157_s4 = inlined_call_operand.vmem [shape: bf16[128,256], index: 4, kind: input, shape index: {}]   ;;  %s1158_s5 = inlined_call_operand.vmem [shape: f32[128,79], index: 5, kind: output, shape index: {}]  }
   0x1   :  { %v859_v0 = vld [vmem:[%s1153_s0] sm:$0xff]  ;;  %v869_v2 = vld [vmem:[%s1153_s0 + $0x8] sm:$0xff]  ;;  %721 = vset.pattern.permute.xlu1 %v822_v3  ;;  %720 = vset.pattern.permute.xlu0 %v822_v3  ;;  %v878_v6 = vld [vmem:[%s1153_s0 + $0x10] sm:$0xff] }
   0x2   :  { %v864_v1 = vld [vmem:[%s1154_s1] ss:$0 sm:$0xff]  ;;  %v886_v10 = vld [vmem:[%s1153_s0 + $0x18] sm:$0xff]  ;;  %v907_v21 = vld [vmem:[%s1153_s0 + $0x28] sm:$0xff] }
   0x3   :  { %v36_v4 = vmul.f32 %v864_v1, %v859_v0  ;;  %v37_v5 = vmul.f32 %v864_v1, %v869_v2  ;;  %v38_v13 = vmul.f32 %v864_v1, %v878_v6  ;;  %v39_v15 = vmul.f32 %v864_v1, %v886_v10  ;;  %v900_v18 = vld [vmem:[%s1153_s0 + $0x20] sm:$0xff]  ;;  %v920_v28 = vld [vmem:[%s1153_s0 + $0x30] sm:$0xff]  ;;  %v927_v31 = vld [vmem:[%s1153_s0 + $0x38] sm:$0xff] }
   0x4   :  { %v40_v23 = vmul.f32 %v864_v1, %v900_v18  ;;  %v41_v25 = vmul.f32 %v864_v1, %v907_v21  ;;  %v42_v33 = vmul.f32 %v864_v1, %v920_v28  ;;  %v43_v35 = vmul.f32 %v864_v1, %v927_v31  ;;  %v166_v42 = vld [vmem:[%s1155_s2 + $0x8] sm:$0xff]  ;;  %v165_v43 = vld [vmem:[%s1155_s2] sm:$0xff]  ;;  %v167_v48 = vld [vmem:[%s1155_s2 + $0x10] sm:$0xff] }
   0x5   :  { %v45_v7 = vsel %vm44_vm0, %v36_v4, 0.0  ;;  %v69_v8 = vmul.f32 %v36_v4, %v859_v0  ;;  %v70_v9 = vmul.f32 %v37_v5, %v869_v2  ;;  %v48_v12 = vsel %vm44_vm0, %v37_v5, 0.0  ;;  %v221_v44 = vld [vmem:[%s1156_s3] sm:$0xff]  ;;  %v170_v45 = vld [vmem:[%s1155_s2 + $0x28] sm:$0xff]  ;;  %v172_v49 = vld [vmem:[%s1155_s2 + $0x38] sm:$0xff] }
   0x6   :  { %46 = vadd.xlane.f32.xlu0 %v45_v7  ;;  %v51_v16 = vsel %vm44_vm0, %v38_v13, 0.0  ;;  %v71_v17 = vmul.f32 %v38_v13, %v878_v6  ;;  %v54_v19 = vsel %vm44_vm0, %v39_v15, 0.0  ;;  %v72_v20 = vmul.f32 %v39_v15, %v886_v10  ;;  %v222_v46 = vld [vmem:[%s1156_s3 + $0x8] sm:$0xff]  ;;  %v168_v50 = vld [vmem:[%s1155_s2 + $0x18] sm:$0xff]  ;;  %v223_v52 = vld [vmem:[%s1156_s3 + $0x10] sm:$0xff] }
   0x7   :  { %v77_v11 = vsel %vm44_vm0, %v69_v8, 0.0  ;;  %v80_v14 = vsel %vm44_vm0, %v70_v9, 0.0  ;;  %v57_v26 = vsel %vm44_vm0, %v40_v23, 0.0  ;;  %v73_v27 = vmul.f32 %v40_v23, %v900_v18  ;;  %v226_v47 = vld [vmem:[%s1156_s3 + $0x28] sm:$0xff]  ;;  %v228_v51 = vld [vmem:[%s1156_s3 + $0x38] sm:$0xff]  ;;  %v169_v54 = vld [vmem:[%s1155_s2 + $0x20] sm:$0xff] }
   0x8   :  { %78 = vadd.xlane.f32.xlu1 %v77_v11  ;;  %v83_v22 = vsel %vm44_vm0, %v71_v17, 0.0  ;;  %v86_v24 = vsel %vm44_vm0, %v72_v20, 0.0  ;;  %v60_v29 = vsel %vm44_vm0, %v41_v25, 0.0  ;;  %v74_v30 = vmul.f32 %v41_v25, %v907_v21  ;;  %v224_v53 = vld [vmem:[%s1156_s3 + $0x18] sm:$0xff]  ;;  %v225_v55 = vld [vmem:[%s1156_s3 + $0x20] sm:$0xff]  ;;  %v171_v56 = vld [vmem:[%s1155_s2 + $0x30] sm:$0xff] }
   0x9   :  { %v89_v32 = vsel %vm44_vm0, %v73_v27, 0.0  ;;  %v63_v36 = vsel %vm44_vm0, %v42_v33, 0.0  ;;  %v75_v37 = vmul.f32 %v42_v33, %v920_v28  ;;  %v66_v38 = vsel %vm44_vm0, %v43_v35, 0.0  ;;  %v227_v57 = vld [vmem:[%s1156_s3 + $0x30] sm:$0xff]  ;;  %s823_s2 = smov 122   ;;  %s824_s3 = smov 121  }
   0xa   :  { %49 = vadd.xlane.f32.xlu0 %v48_v12  ;;  %v92_v34 = vsel %vm44_vm0, %v74_v30, 0.0  ;;  %v76_v39 = vmul.f32 %v43_v35, %v927_v31 }
   0xb   :  { %v95_v40 = vsel %vm44_vm0, %v75_v37, 0.0 }
   0xc   :  { %81 = vadd.xlane.f32.xlu1 %v80_v14  ;;  %v98_v41 = vsel %vm44_vm0, %v76_v39, 0.0 }
   0xe   :  { %52 = vadd.xlane.f32.xlu0 %v51_v16 }
  0x10   :  { %55 = vadd.xlane.f32.xlu1 %v54_v19 }
  0x12   :  { %84 = vadd.xlane.f32.xlu0 %v83_v22 }
  0x14   :  { %87 = vadd.xlane.f32.xlu1 %v86_v24 }
  0x16   :  { %58 = vadd.xlane.f32.xlu0 %v57_v26 }
  0x18   :  { %61 = vadd.xlane.f32.xlu1 %v60_v29 }
  0x1a   :  { %90 = vadd.xlane.f32.xlu0 %v89_v32 }
  0x1c   :  { %93 = vadd.xlane.f32.xlu1 %v92_v34 }
  0x1e   :  { %64 = vadd.xlane.f32.xlu0 %v63_v36 }
  0x20   :  { %67 = vadd.xlane.f32.xlu1 %v66_v38 }
  0x22   :  { %96 = vadd.xlane.f32.xlu0 %v95_v40 }
  0x24   :  { %99 = vadd.xlane.f32.xlu1 %v98_v41 }
  0x35   :  { %180 = vperm.xlu1 %721, %v166_v42  }
  0x38   :  { %175 = vperm.xlu0 %720, %v165_v43  }
  0x39   :  { %231 = vperm.xlu1 %721, %v221_v44  }
  0x3c   :  { %200 = vperm.xlu0 %720, %v170_v45  }
  0x3d   :  { %236 = vperm.xlu1 %721, %v222_v46  }
  0x40   :  { %256 = vperm.xlu0 %720, %v226_v47  }
  0x41   :  { %185 = vperm.xlu1 %721, %v167_v48  }
  0x44   :  { %210 = vperm.xlu0 %720, %v172_v49  }
  0x45   :  { %190 = vperm.xlu1 %721, %v168_v50  }
  0x48   :  { %266 = vperm.xlu0 %720, %v228_v51  }
  0x49   :  { %241 = vperm.xlu1 %721, %v223_v52  }
  0x4d   :  { %246 = vperm.xlu1 %721, %v224_v53  }
  0x51   :  { %195 = vperm.xlu1 %721, %v169_v54  }
  0x55   :  { %251 = vperm.xlu1 %721, %v225_v55  }
  0x59   :  { %205 = vperm.xlu1 %721, %v171_v56  }
  0x5d   :  { %261 = vperm.xlu1 %721, %v227_v57  }
  0x93   :  { %v47_v58 = vpop.xlane.xlu0 %46 }
  0x94   :  { %v101_v61 = vmul.f32 0.03125, %v47_v58 }
  0x95   :  { %v79_v59 = vpop.xlane.xlu1 %78 }
  0x96   :  { %v117_v3 = vmul.f32 %v101_v61, %v101_v61  ;;  %v109_v4 = vmul.f32 0.03125, %v79_v59  ;;  %v133_v41 = vsub.f32 %v859_v0, %v101_v61 }
  0x97   :  { %v50_v60 = vpop.xlane.xlu0 %49 }
  0x98   :  { %v102_v5 = vmul.f32 0.03125, %v50_v60  ;;  %v125_v9 = vsub.f32 %v109_v4, %v117_v3 }
  0x99   :  { %v82_v62 = vpop.xlane.xlu1 %81 }
  0x9a   :  { %v118_v11 = vmul.f32 %v102_v5, %v102_v5  ;;  %v110_v12 = vmul.f32 0.03125, %v82_v62  ;;  %v141_v15 = vadd.f32 1e-05, %v125_v9  ;;  %v134_v51 = vsub.f32 %v869_v2, %v102_v5 }
  0x9b   :  { %v53_v63 = vpop.xlane.xlu0 %52 }
  0x9c   :  { %v126_v16 = vsub.f32 %v110_v12, %v118_v11  ;;  %806 = vrsqrt.f32 %v141_v15  ;;  %v989_v23 = vmul.f32 0.03125, %v53_v63 }
  0x9d   :  { %v56_v7 = vpop.xlane.xlu1 %55 }
  0x9e   :  { %v142_v22 = vadd.f32 1e-05, %v126_v16  ;;  %v119_v30 = vmul.f32 %v989_v23, %v989_v23  ;;  %v993_v34 = vmul.f32 0.03125, %v56_v7 }
  0x9f   :  { %v85_v8 = vpop.xlane.xlu0 %84 }
  0xa0   :  { %808 = vrsqrt.f32 %v142_v22  ;;  %v111_v32 = vmul.f32 0.03125, %v85_v8  ;;  %v120_v42 = vmul.f32 %v993_v34, %v993_v34 }
  0xa1   :  { %v88_v13 = vpop.xlane.xlu1 %87 }
  0xa2   :  { %v112_v37 = vmul.f32 0.03125, %v88_v13  ;;  %v127_v38 = vsub.f32 %v111_v32, %v119_v30 }
  0xa3   :  { %v59_v14 = vpop.xlane.xlu0 %58 }
  0xa4   :  { %v128_v46 = vsub.f32 %v112_v37, %v120_v42  ;;  %v143_v48 = vadd.f32 1e-05, %v127_v38  ;;  %v998_v49 = vmul.f32 0.03125, %v59_v14 }
  0xa5   :  { %v62_v17 = vpop.xlane.xlu1 %61 }
  0xa6   :  { %v106_v19 = vmul.f32 0.03125, %v62_v17  ;;  %v807_v45 = vpop.eup %806  ;;  %v144_v56 = vadd.f32 1e-05, %v128_v46  ;;  %v121_v58 = vmul.f32 %v998_v49, %v998_v49 }
  0xa7   :  { %v91_v20 = vpop.xlane.xlu0 %90  ;;  %v157_v53 = vmul.f32 %v807_v45, %v133_v41 }
  0xa8   :  { %v122_v25 = vmul.f32 %v106_v19, %v106_v19  ;;  %v138_v57 = vsub.f32 %v907_v21, %v106_v19  ;;  %v113_v59 = vmul.f32 0.03125, %v91_v20 }
  0xa9   :  { %v94_v24 = vpop.xlane.xlu1 %93 }
  0xaa   :  { %v114_v26 = vmul.f32 0.03125, %v94_v24  ;;  %v809_v54 = vpop.eup %808  ;;  %v129_v7 = vsub.f32 %v113_v59, %v121_v58 }
  0xab   :  { %v65_v27 = vpop.xlane.xlu0 %64  ;;  %v158_v62 = vmul.f32 %v809_v54, %v134_v51 }
  0xac   :  { %v130_v29 = vsub.f32 %v114_v26, %v122_v25  ;;  %v1004_v8 = vmul.f32 0.03125, %v65_v27  ;;  %v145_v16 = vadd.f32 1e-05, %v129_v7  ;;  %v135_v25 = vsub.f32 %v878_v6, %v989_v23 }
  0xad   :  { %v68_v33 = vpop.xlane.xlu1 %67  ;;  %v136_v6 = vsub.f32 %v886_v10, %v993_v34  ;;  %v137_v10 = vsub.f32 %v900_v18, %v998_v49 }
  0xae   :  { %v146_v35 = vadd.f32 1e-05, %v130_v29  ;;  %v108_v36 = vmul.f32 0.03125, %v68_v33  ;;  %v123_v19 = vmul.f32 %v1004_v8, %v1004_v8  ;;  %v139_v49 = vsub.f32 %v920_v28, %v1004_v8 }
  0xaf   :  { %v97_v40 = vpop.xlane.xlu0 %96 }
  0xb0   :  { %810 = vrsqrt.f32 %v146_v35  ;;  %v124_v43 = vmul.f32 %v108_v36, %v108_v36  ;;  %v140_v17 = vsub.f32 %v927_v31, %v108_v36  ;;  %v115_v20 = vmul.f32 0.03125, %v97_v40 }
  0xb1   :  { %v100_v39 = vpop.xlane.xlu1 %99 }
  0xb2   :  { %v116_v44 = vmul.f32 0.03125, %v100_v39  ;;  %v131_v31 = vsub.f32 %v115_v20, %v123_v19 }
  0xb4   :  { %v132_v47 = vsub.f32 %v116_v44, %v124_v43  ;;  %v147_v41 = vadd.f32 1e-05, %v131_v31 }
  0xb5   :  { %v181_v50 = vpop.permute.xlu1 %180 }
  0xb6   :  { %v148_v52 = vadd.f32 1e-05, %v132_v47  ;;  %v214_v4 = vmul.f32 %v181_v50, %v158_v62 }
  0xb7   :  { %v176_v55 = vpop.permute.xlu0 %175 }
  0xb8   :  { %812 = vrsqrt.f32 %v148_v52  ;;  %v213_v0 = vmul.f32 %v176_v55, %v157_v53 }
  0xb9   :  { %814 = vrsqrt.f32 %v143_v48  ;;  %v232_v60 = vpop.permute.xlu1 %231 }
  0xba   :  { %v811_v61 = vpop.eup %810  ;;  %v269_v63 = vadd.f32 %v232_v60, %v213_v0  ;;  %816 = vrsqrt.f32 %v144_v56 }
  0xbb   :  { %v162_v3 = vmul.f32 %v811_v61, %v138_v57  ;;  %v201_v2 = vpop.permute.xlu0 %200  ;;  %818 = vrsqrt.f32 %v145_v16 }
  0xbc   :  { %v277_v5 = vmax.f32 %v269_v63, 0.0  ;;  %820 = vrsqrt.f32 %v147_v41 }
  0xbd   :  { %v218_v9 = vmul.f32 %v201_v2, %v162_v3  ;;  %v237_v11 = vpop.permute.xlu1 %236 }
  0xbe   :  { %v285_v21 = vmul.f32 %v864_v1, %v277_v5  ;;  %v270_v12 = vadd.f32 %v237_v11, %v214_v4 }
  0xbf   :  { %v257_v13 = vpop.permute.xlu0 %256 }
  0xc0   :  { %293 = vst.msk [vmem:[#allocation2] sm:$0xff] %vm44_vm0, %v285_v21  ;;  %v278_v14 = vmax.f32 %v270_v12, 0.0  ;;  %v274_v15 = vadd.f32 %v257_v13, %v218_v9 }
  0xc1   :  { %v186_v22 = vpop.permute.xlu1 %185 }
  0xc2   :  { %v813_v24 = vpop.eup %812  ;;  %v286_v26 = vmul.f32 %v864_v1, %v278_v14  ;;  %v282_v27 = vmax.f32 %v274_v15, 0.0 }
  0xc3   :  { %v815_v29 = vpop.eup %814  ;;  %v164_v30 = vmul.f32 %v813_v24, %v140_v17  ;;  %v211_v32 = vpop.permute.xlu0 %210 }
  0xc4   :  { %294 = vst.msk [vmem:[#allocation2 + $0x8] sm:$0xff] %vm44_vm0, %v286_v26  ;;  %v290_v33 = vmul.f32 %v864_v1, %v282_v27  ;;  %v159_v37 = vmul.f32 %v815_v29, %v135_v25  ;;  %v817_v38 = vpop.eup %816  ;;  %v787_v25 = vld [vmem:[%s1157_s4 + $0x44] ss:$8 sps:$4 sm:$0xff]  }
  0xc5   :  { %v220_v35 = vmul.f32 %v211_v32, %v164_v30  ;;  %v191_v36 = vpop.permute.xlu1 %190  ;;  %v160_v43 = vmul.f32 %v817_v38, %v136_v6  ;;  %v819_v56 = vpop.eup %818  ;;  %565 = vmatprep.mubr.bf16.mxu1 %v787_v25 }
  0xc6   :  { %298 = vst.msk [vmem:[#allocation2 + $0x28] sm:$0xff] %vm44_vm0, %v290_v33  ;;  %v215_v23 = vmul.f32 %v186_v22, %v159_v37  ;;  %v161_v59 = vmul.f32 %v819_v56, %v137_v10  ;;  %v821_v62 = vpop.eup %820 }
  0xc7   :  { %v267_v39 = vpop.permute.xlu0 %266  ;;  %v301_v46 = vld [vmem:[#allocation2] sm:$0xff]  ;;  %v216_v48 = vmul.f32 %v191_v36, %v160_v43  ;;  %v163_v4 = vmul.f32 %v821_v62, %v139_v49 }
  0xc8   :  { %v276_v40 = vadd.f32 %v267_v39, %v220_v35 }
  0xc9   :  { %v242_v42 = vpop.permute.xlu1 %241 }
  0xca   :  { %v284_v44 = vmax.f32 %v276_v40, 0.0  ;;  %v271_v45 = vadd.f32 %v242_v42, %v215_v23 }
  0xcb   :  { %v302_v47 = vld [vmem:[#allocation2 + $0x8] sm:$0xff] }
  0xcc   :  { %v292_v50 = vmul.f32 %v864_v1, %v284_v44  ;;  %v279_v51 = vmax.f32 %v271_v45, 0.0  ;;  %v722_v52 = vpack.i.bf16 %v302_v47, %v301_v46  ;;  %v1020_v54 = vpack.c.bf16 %v302_v47, %v301_v46 }
  0xcd   :  { %v247_v53 = vpop.permute.xlu1 %246  ;;  %v306_v15 = vld [vmem:[#allocation2 + $0x28] sm:$0xff] }
  0xce   :  { %300 = vst.msk [vmem:[#allocation2 + $0x38] sm:$0xff] %vm44_vm0, %v292_v50  ;;  %v287_v34 = vmul.f32 %v864_v1, %v279_v51  ;;  %v272_v55 = vadd.f32 %v247_v53, %v216_v48  ;;  %723 = vrot.lane.b32.xlu1 %v722_v52, %s823_s2 }
  0xd0   :  { %295 = vst.msk [vmem:[#allocation2 + $0x10] sm:$0xff] %vm44_vm0, %v287_v34  ;;  %v280_v0 = vmax.f32 %v272_v55, 0.0 }
  0xd1   :  { %v196_v57 = vpop.permute.xlu1 %195 }
  0xd2   :  { %v288_v58 = vmul.f32 %v864_v1, %v280_v0  ;;  %v217_v60 = vmul.f32 %v196_v57, %v161_v59 }
  0xd4   :  { %296 = vst.msk [vmem:[#allocation2 + $0x18] sm:$0xff] %vm44_vm0, %v288_v58 }
  0xd5   :  { %v252_v18 = vpop.permute.xlu1 %251  ;;  %v308_v20 = vld [vmem:[#allocation2 + $0x38] sm:$0xff] }
  0xd6   :  { %v273_v61 = vadd.f32 %v252_v18, %v217_v60 }
  0xd7   :  { %v303_v5 = vld [vmem:[#allocation2 + $0x10] sm:$0xff] }
  0xd8   :  { %v281_v63 = vmax.f32 %v273_v61, 0.0 }
  0xd9   :  { %v206_v3 = vpop.permute.xlu1 %205 }
  0xda   :  { %v289_v2 = vmul.f32 %v864_v1, %v281_v63  ;;  %v219_v9 = vmul.f32 %v206_v3, %v163_v4 }
  0xdb   :  { %v304_v7 = vld [vmem:[#allocation2 + $0x18] sm:$0xff] }
  0xdc   :  { %297 = vst.msk [vmem:[#allocation2 + $0x20] sm:$0xff] %vm44_vm0, %v289_v2  ;;  %v727_v11 = vpack.i.bf16 %v304_v7, %v303_v5  ;;  %v406_v21 = vpack.c.bf16 %v304_v7, %v303_v5 }
  0xdd   :  { %v262_v12 = vpop.permute.xlu1 %261 }
  0xde   :  { %v275_v13 = vadd.f32 %v262_v12, %v219_v9  ;;  %728 = vrot.lane.b32.xlu0 %v727_v11, %s823_s2  ;;  %v788_v12 = vld [vmem:[%s1157_s4 + $0x14] ss:$8 sps:$4 sm:$0xff]  }
  0xe0   :  { %v283_v14 = vmax.f32 %v275_v13, 0.0  ;;  %v790_v13 = vld [vmem:[%s1157_s4 + $0x54] ss:$8 sps:$4 sm:$0xff]  }
  0xe2   :  { %v291_v28 = vmul.f32 %v864_v1, %v283_v14  ;;  %v784_v1 = vld [vmem:[%s1157_s4 + $0x4] ss:$8 sps:$4 sm:$0xff]   ;;  %v792_v14 = vld [vmem:[%s1157_s4 + $0x10] ss:$8 sps:$4 sm:$0xff]  }
  0xe3   :  { %v305_v8 = vld [vmem:[#allocation2 + $0x20] sm:$0xff]  ;;  %533 = vmatprep.mubr.bf16.mxu0 %v784_v1 }
  0xe4   :  { %299 = vst.msk [vmem:[#allocation2 + $0x30] sm:$0xff] %vm44_vm0, %v291_v28  ;;  %v732_v16 = vpack.i.bf16 %v306_v15, %v305_v8  ;;  %v407_v17 = vpack.c.bf16 %v306_v15, %v305_v8  ;;  %v793_v28 = vld [vmem:[%s1157_s4 + $0x50] ss:$8 sps:$4 sm:$0xff]   ;;  %v794_v8 = vld [vmem:[%s1157_s4 + $0x24] ss:$8 sps:$4 sm:$0xff]  }
  0xe5   :  { %v796_v15 = vld [vmem:[%s1157_s4 + $0x64] ss:$8 sps:$4 sm:$0xff]  }
  0xe6   :  { %733 = vrot.lane.b32.xlu1 %v732_v16, %s823_s2 }
  0xea   :  { %743 = vrot.lane.b32.xlu1 %v722_v52, %s824_s3 }
  0xeb   :  { %v307_v19 = vld [vmem:[#allocation2 + $0x30] sm:$0xff] }
  0xec   :  { %v737_v22 = vpack.i.bf16 %v308_v20, %v307_v19  ;;  %v408_v24 = vpack.c.bf16 %v308_v20, %v307_v19  ;;  %v800_v19 = vld [vmem:[%s1157_s4 + $0x34] ss:$8 sps:$4 sm:$0xff]  }
  0xed   :  { %v802_v20 = vld [vmem:[%s1157_s4 + $0x74] ss:$8 sps:$4 sm:$0xff]  }
  0xee   :  { %753 = vrot.lane.b32.xlu1 %v727_v11, %s824_s3  ;;  %738 = vrot.lane.b32.xlu0 %v737_v22, %s823_s2 }
  0xf2   :  { %763 = vrot.lane.b32.xlu1 %v732_v16, %s824_s3  ;;  %748 = vrot.lane.b32.xlu0 %v722_v52, %s825_s14 }
  0xf6   :  { %773 = vrot.lane.b32.xlu1 %v737_v22, %s824_s3  ;;  %758 = vrot.lane.b32.xlu0 %v727_v11, %s825_s14  ;;  %v782_v11 = vld [vmem:[%s1157_s4] ss:$8 sps:$4 sm:$0xff]  }
  0xfa   :  { %768 = vrot.lane.b32.xlu0 %v732_v16, %s825_s14  ;;  %v798_v16 = vld [vmem:[%s1157_s4 + $0x20] ss:$8 sps:$4 sm:$0xff]  }
  0xfe   :  { %778 = vrot.lane.b32.xlu0 %v737_v22, %s825_s14  ;;  %v804_v22 = vld [vmem:[%s1157_s4 + $0x30] ss:$8 sps:$4 sm:$0xff]  }
 0x140   :  { %v724_v26 = vpop.permute.xlu1 %723 }
 0x141   :  { %v726_v27 = vunpack.i.h.bf16 %v724_v26  ;;  %v725_v29 = vunpack.i.l.bf16 %v724_v26 }
 0x143   :  { %v413_v30 = vpack.c.bf16 %v726_v27, %v725_v29 }
 0x145   :  { %636 = vmatprep.subr.bf16.mxu0 %v413_v30  ;;  %700 = vmatprep.subr.bf16.mxu1 %v413_v30 }
 0x146   :  { %637 = vmatpush3.bf16.msra.mxu0 %v1020_v54  ;;  %708 = vmatpush3.bf16.msra.mxu1 %v1020_v54 }
 0x150   :  { %v729_v32 = vpop.permute.xlu0 %728 }
 0x151   :  { %v731_v33 = vunpack.i.h.bf16 %v729_v32  ;;  %v730_v31 = vunpack.i.l.bf16 %v729_v32 }
 0x153   :  { %v414_v35 = vpack.c.bf16 %v731_v33, %v730_v31 }
 0x155   :  { %638 = vmatprep.subr.bf16.mxu0 %v414_v35  ;;  %701 = vmatprep.subr.bf16.mxu1 %v414_v35 }
 0x156   :  { %639 = vmatpush3.bf16.msra.mxu0 %v406_v21  ;;  %709 = vmatpush3.bf16.msra.mxu1 %v406_v21  ;;  %v785_v21 = vld [vmem:[%s1157_s4 + $0x40] ss:$8 sps:$4 sm:$0xff]  }
 0x158   :  { %v734_v36 = vpop.permute.xlu1 %733 }
 0x159   :  { %v736_v37 = vunpack.i.h.bf16 %v734_v36  ;;  %v735_v38 = vunpack.i.l.bf16 %v734_v36 }
 0x15b   :  { %v415_v39 = vpack.c.bf16 %v736_v37, %v735_v38 }
 0x15c   :  { %v744_v6 = vpop.permute.xlu1 %743 }
 0x15d   :  { %640 = vmatprep.subr.bf16.mxu0 %v415_v39  ;;  %702 = vmatprep.subr.bf16.mxu1 %v415_v39  ;;  %v746_v23 = vunpack.i.h.bf16 %v744_v6  ;;  %v745_v40 = vunpack.i.l.bf16 %v744_v6 }
 0x15e   :  { %641 = vmatpush3.bf16.msra.mxu0 %v407_v17  ;;  %710 = vmatpush3.bf16.msra.mxu1 %v407_v17  ;;  %v799_v17 = vld [vmem:[%s1157_s4 + $0x60] ss:$8 sps:$4 sm:$0xff]  }
 0x15f   :  { %v417_v46 = vpack.c.bf16 %v746_v23, %v745_v40 }
 0x160   :  { %v754_v41 = vpop.permute.xlu1 %753  ;;  %v739_v42 = vpop.permute.xlu0 %738 }
 0x161   :  { %v741_v43 = vunpack.i.h.bf16 %v739_v42  ;;  %v740_v44 = vunpack.i.l.bf16 %v739_v42  ;;  %v756_v50 = vunpack.i.h.bf16 %v754_v41  ;;  %v755_v51 = vunpack.i.l.bf16 %v754_v41 }
 0x163   :  { %v416_v45 = vpack.c.bf16 %v741_v43, %v740_v44  ;;  %v418_v56 = vpack.c.bf16 %v756_v50, %v755_v51 }
 0x164   :  { %v764_v47 = vpop.permute.xlu1 %763  ;;  %v749_v48 = vpop.permute.xlu0 %748 }
 0x165   :  { %v751_v52 = vunpack.i.h.bf16 %v749_v48  ;;  %v750_v53 = vunpack.i.l.bf16 %v749_v48  ;;  %642 = vmatprep.subr.bf16.mxu0 %v416_v45  ;;  %703 = vmatprep.subr.bf16.mxu1 %v416_v45  ;;  %v766_v10 = vunpack.i.h.bf16 %v764_v47  ;;  %v765_v34 = vunpack.i.l.bf16 %v764_v47 }
 0x166   :  { %643 = vmatpush3.bf16.msra.mxu0 %v408_v24  ;;  %711 = vmatpush3.bf16.msra.mxu1 %v408_v24  ;;  %v805_v24 = vld [vmem:[%s1157_s4 + $0x70] ss:$8 sps:$4 sm:$0xff]  }
 0x167   :  { %v409_v54 = vpack.c.bf16 %v751_v52, %v750_v53  ;;  %644 = vmatprep.subr.bf16.mxu0 %v417_v46  ;;  %704 = vmatprep.subr.bf16.mxu1 %v417_v46  ;;  %v419_v60 = vpack.c.bf16 %v766_v10, %v765_v34 }
 0x168   :  { %v759_v55 = vpop.permute.xlu0 %758  ;;  %v774_v58 = vpop.permute.xlu1 %773 }
 0x169   :  { %v761_v0 = vunpack.i.h.bf16 %v759_v55  ;;  %v760_v57 = vunpack.i.l.bf16 %v759_v55  ;;  %v776_v49 = vunpack.i.h.bf16 %v774_v58  ;;  %v775_v61 = vunpack.i.l.bf16 %v774_v58 }
 0x16a   :  { %645 = vmatpush3.bf16.msra.mxu0 %v409_v54  ;;  %712 = vmatpush3.bf16.msra.mxu1 %v409_v54 }
 0x16b   :  { %v410_v59 = vpack.c.bf16 %v761_v0, %v760_v57  ;;  %646 = vmatprep.subr.bf16.mxu0 %v418_v56  ;;  %705 = vmatprep.subr.bf16.mxu1 %v418_v56  ;;  %v420_v4 = vpack.c.bf16 %v776_v49, %v775_v61 }
 0x16c   :  { %v769_v18 = vpop.permute.xlu0 %768 }
 0x16d   :  { %v771_v62 = vunpack.i.h.bf16 %v769_v18  ;;  %v770_v63 = vunpack.i.l.bf16 %v769_v18 }
 0x16e   :  { %647 = vmatpush3.bf16.msra.mxu0 %v410_v59  ;;  %713 = vmatpush3.bf16.msra.mxu1 %v410_v59 }
 0x16f   :  { %v411_v3 = vpack.c.bf16 %v771_v62, %v770_v63  ;;  %648 = vmatprep.subr.bf16.mxu0 %v419_v60  ;;  %706 = vmatprep.subr.bf16.mxu1 %v419_v60 }
 0x170   :  { %v779_v2 = vpop.permute.xlu0 %778 }
 0x171   :  { %v781_v5 = vunpack.i.h.bf16 %v779_v2  ;;  %v780_v7 = vunpack.i.l.bf16 %v779_v2 }
 0x172   :  { %649 = vmatpush3.bf16.msra.mxu0 %v411_v3  ;;  %714 = vmatpush3.bf16.msra.mxu1 %v411_v3 }
 0x173   :  { %v412_v9 = vpack.c.bf16 %v781_v5, %v780_v7  ;;  %650 = vmatprep.subr.bf16.mxu0 %v420_v4  ;;  %707 = vmatprep.subr.bf16.mxu1 %v420_v4 }
 0x176   :  { %651 = vmatpush3.bf16.msra.mxu0 %v412_v9  ;;  %715 = vmatpush3.bf16.msra.mxu1 %v412_v9 }
 0x179   :  { %534 = vmatmul.mubr.bf16.vlgmr.msra.gmra.mrb[0].mxu0 %v782_v11  ;;  %566 = vmatmul.mubr.bf16.vlgmr.msra.gmra.mrb[0].mxu1 %v785_v21 }
 0x17a   :  { %541 = vmatprep.mubr.bf16.mxu0 %v788_v12  ;;  %573 = vmatprep.mubr.bf16.mxu1 %v790_v13 }
 0x181   :  { %542 = vmatmul.mubr.bf16.gmra.mrb[4].mxu0 %v792_v14  ;;  %574 = vmatmul.mubr.bf16.gmra.mrb[4].mxu1 %v793_v28 }
 0x182   :  { %549 = vmatprep.mubr.bf16.mxu0 %v794_v8  ;;  %581 = vmatprep.mubr.bf16.mxu1 %v796_v15 }
 0x189   :  { %550 = vmatmul.mubr.bf16.gmra.mrb[8].mxu0 %v798_v16  ;;  %582 = vmatmul.mubr.bf16.gmra.mrb[8].mxu1 %v799_v17 }
 0x18a   :  { %557 = vmatprep.mubr.bf16.mxu0 %v800_v19  ;;  %589 = vmatprep.mubr.bf16.mxu1 %v802_v20 }
 0x191   :  { %558 = vmatmul.mubr.bf16.gmra.mrb[12].mxu0 %v804_v22  ;;  %590 = vmatmul.mubr.bf16.gmra.mrb[12].mxu1 %v805_v24 }
 0x24c   :  { %v652_v1 = vpop.f32.mrb[0].mxu0  ;;  %v676_v25 = vpop.f32.mrb[0].mxu1 }
 0x24d   :  { %v653_v26 = vpop.f32.mrb[1].mxu0  ;;  %v677_v27 = vpop.f32.mrb[1].mxu1 }
 0x24e   :  { %v654_v29 = vadd.f32 %v653_v26, %v652_v1  ;;  %v678_v30 = vadd.f32 %v677_v27, %v676_v25  ;;  %v655_v32 = vpop.f32.mrb[2].mxu0  ;;  %v679_v33 = vpop.f32.mrb[2].mxu1 }
 0x24f   :  { %v656_v31 = vpop.f32.mrb[3].mxu0  ;;  %v680_v35 = vpop.f32.mrb[3].mxu1 }
 0x250   :  { %599 = vst.msk [vmem:[%s1158_s5] sm:$0xff] %vm598_vm1, %v654_v29  ;;  %607 = vst.msk [vmem:[%s1158_s5 + $0x40] sm:$0xff] %vm598_vm1, %v678_v30  ;;  %v657_v36 = vadd.f32 %v656_v31, %v655_v32  ;;  %v681_v37 = vadd.f32 %v680_v35, %v679_v33 }
 0x252   :  { %600 = vst.msk [vmem:[%s1158_s5 + $0x8] sm:$0xff] %vm598_vm1, %v657_v36  ;;  %608 = vst.msk [vmem:[%s1158_s5 + $0x48] sm:$0xff] %vm598_vm1, %v681_v37 }
 0x254   :  { %v658_v38 = vpop.f32.mrb[4].mxu0  ;;  %v682_v39 = vpop.f32.mrb[4].mxu1 }
 0x255   :  { %v659_v6 = vpop.f32.mrb[5].mxu0  ;;  %v683_v23 = vpop.f32.mrb[5].mxu1 }
 0x256   :  { %v660_v40 = vadd.f32 %v659_v6, %v658_v38  ;;  %v684_v41 = vadd.f32 %v683_v23, %v682_v39  ;;  %v661_v42 = vpop.f32.mrb[6].mxu0  ;;  %v685_v43 = vpop.f32.mrb[6].mxu1 }
 0x257   :  { %v662_v44 = vpop.f32.mrb[7].mxu0  ;;  %v686_v45 = vpop.f32.mrb[7].mxu1 }
 0x258   :  { %601 = vst.msk [vmem:[%s1158_s5 + $0x10] sm:$0xff] %vm598_vm1, %v660_v40  ;;  %609 = vst.msk [vmem:[%s1158_s5 + $0x50] sm:$0xff] %vm598_vm1, %v684_v41  ;;  %v663_v46 = vadd.f32 %v662_v44, %v661_v42  ;;  %v687_v47 = vadd.f32 %v686_v45, %v685_v43 }
 0x25a   :  { %602 = vst.msk [vmem:[%s1158_s5 + $0x18] sm:$0xff] %vm598_vm1, %v663_v46  ;;  %610 = vst.msk [vmem:[%s1158_s5 + $0x58] sm:$0xff] %vm598_vm1, %v687_v47 }
 0x25c   :  { %v664_v48 = vpop.f32.mrb[8].mxu0  ;;  %v688_v50 = vpop.f32.mrb[8].mxu1 }
 0x25d   :  { %v665_v51 = vpop.f32.mrb[9].mxu0  ;;  %v689_v52 = vpop.f32.mrb[9].mxu1 }
 0x25e   :  { %v666_v53 = vadd.f32 %v665_v51, %v664_v48  ;;  %v690_v54 = vadd.f32 %v689_v52, %v688_v50  ;;  %v667_v10 = vpop.f32.mrb[10].mxu0  ;;  %v691_v34 = vpop.f32.mrb[10].mxu1 }
 0x25f   :  { %v668_v55 = vpop.f32.mrb[11].mxu0  ;;  %v692_v56 = vpop.f32.mrb[11].mxu1 }
 0x260   :  { %603 = vst.msk [vmem:[%s1158_s5 + $0x20] sm:$0xff] %vm598_vm1, %v666_v53  ;;  %611 = vst.msk [vmem:[%s1158_s5 + $0x60] sm:$0xff] %vm598_vm1, %v690_v54  ;;  %v669_v0 = vadd.f32 %v668_v55, %v667_v10  ;;  %v693_v57 = vadd.f32 %v692_v56, %v691_v34 }
 0x262   :  { %604 = vst.msk [vmem:[%s1158_s5 + $0x28] sm:$0xff] %vm598_vm1, %v669_v0  ;;  %612 = vst.msk [vmem:[%s1158_s5 + $0x68] sm:$0xff] %vm598_vm1, %v693_v57 }
 0x264   :  { %v670_v58 = vpop.f32.mrb[12].mxu0  ;;  %v694_v59 = vpop.f32.mrb[12].mxu1 }
 0x265   :  { %v671_v60 = vpop.f32.mrb[13].mxu0  ;;  %v695_v18 = vpop.f32.mrb[13].mxu1 }
 0x266   :  { %v672_v49 = vadd.f32 %v671_v60, %v670_v58  ;;  %v696_v61 = vadd.f32 %v695_v18, %v694_v59  ;;  %v673_v62 = vpop.f32.mrb[14].mxu0  ;;  %v697_v63 = vpop.f32.mrb[14].mxu1 }
 0x267   :  { %v674_v3 = vpop.f32.mrb[15].mxu0  ;;  %v698_v2 = vpop.f32.mrb[15].mxu1 }
 0x268   :  { %605 = vst.msk [vmem:[%s1158_s5 + $0x30] sm:$0xff] %vm598_vm1, %v672_v49  ;;  %613 = vst.msk [vmem:[%s1158_s5 + $0x70] sm:$0xff] %vm598_vm1, %v696_v61  ;;  %v675_v4 = vadd.f32 %v674_v3, %v673_v62  ;;  %v699_v5 = vadd.f32 %v698_v2, %v697_v63 }
 0x26a   :  { %606 = vst.msk [vmem:[%s1158_s5 + $0x38] sm:$0xff] %vm598_vm1, %v675_v4  ;;  %614 = vst.msk [vmem:[%s1158_s5 + $0x78] sm:$0xff] %vm598_vm1, %v699_v5 }

// kernel: generator_forward.6
= control target key start
LH: loop header
LB: loop body
LE: loop exit
PB: predicated region body
PF: predicated region fallthrough
CT: control target
= control target key end

     0   :  { %v31_v0 = vlaneseq  ;;  %v561_v1 = vmov 0   ;;  %vm49_vm0 = vcmask 769024   ;;  %s564_s25 = smov 117   ;;  %vm250_vm1 = vcmask 1039360   ;;  %s810_s1 = inlined_call_operand.vmem [shape: f32[1,222], index: 1, kind: input, shape index: {}]   ;;  %s811_s0 = inlined_call_operand.vmem [shape: f32[32,222], index: 0, kind: input, shape index: {}]   ;;  %s812_s2 = inlined_call_operand.vmem [shape: f32[32,1], index: 2, kind: input, shape index: {}]   ;;  %s813_s3 = inlined_call_operand.vmem [shape: f32[32,1], index: 3, kind: input, shape index: {}]   ;;  %s814_s4 = inlined_call_operand.vmem [shape: bf16[64,128], index: 4, kind: input, shape index: {}]   ;;  %s815_s5 = inlined_call_operand.vmem [shape: f32[64,211], index: 5, kind: output, shape index: {}]  }
   0x1   :  { %488 = vset.pattern.permute.xlu1 %v561_v1  ;;  %487 = vset.pattern.permute.xlu0 %v561_v1  ;;  %v29_v3 = vld [vmem:[%s810_s1] sm:$0x3]  ;;  %v605_v4 = vld [vmem:[%s811_s0 + $0x30] sm:$0xff]  ;;  %v610_v7 = vld [vmem:[%s811_s0 + $0x38] sm:$0xff]  ;;  %vm279_vm2 = vcmask 965632   ;;  %vm308_vm3 = vcmask 957440  }
   0x2   :  { %v32_v2 = vshrl.u32 %v31_v0, 7  ;;  %401 = vmatprep.mubr.bf16.mxu0 %v561_v1  ;;  %421 = vmatprep.mubr.bf16.mxu1 %v561_v1  ;;  %v615_v8 = vld [vmem:[%s811_s0] sm:$0xff]  ;;  %v620_v9 = vld [vmem:[%s811_s0 + $0x8] sm:$0xff]  ;;  %v629_v12 = vld [vmem:[%s811_s0 + $0x10] sm:$0xff]  ;;  %vm443_vm4 = vcmask 678912  }
   0x3   :  { %v634_v13 = vld [vmem:[%s811_s0 + $0x18] sm:$0xff]  ;;  %v639_v14 = vld [vmem:[%s811_s0 + $0x28] sm:$0xff]  ;;  %v656_v21 = vld [vmem:[%s811_s0 + $0x20] sm:$0xff] }
   0x4   :  { %v33_v5 = vsub.s32 0, %v32_v2  ;;  %v37_v6 = vsub.s32 1, %v32_v2  ;;  %v131_v48 = vld [vmem:[%s812_s2 + $0x8] sm:$0xff]  ;;  %v162_v49 = vld [vmem:[%s813_s3] sm:$0xff]  ;;  %v132_v52 = vld [vmem:[%s812_s2 + $0x10] sm:$0xff] }
   0x5   :  { %v130_v50 = vld [vmem:[%s812_s2] sm:$0xff]  ;;  %v163_v51 = vld [vmem:[%s813_s3 + $0x8] sm:$0xff]  ;;  %v133_v53 = vld [vmem:[%s812_s2 + $0x18] sm:$0xff]  ;;  %s562_s2 = smov 127  }
   0x6   :  { %v622_v10 = vrot.slane %v29_v3, %v33_v5  ;;  %v624_v11 = vrot.slane %v29_v3, %v37_v6  ;;  %v164_v54 = vld [vmem:[%s813_s3 + $0x10] sm:$0xff]  ;;  %v165_v55 = vld [vmem:[%s813_s3 + $0x18] sm:$0xff]  ;;  %s563_s3 = smov 118  }
   0x8   :  { %v47_v15 = vmul.f32 %v622_v10, %v605_v4  ;;  %v48_v16 = vmul.f32 %v624_v11, %v610_v7  ;;  %v41_v17 = vmul.f32 %v622_v10, %v615_v8  ;;  %v42_v18 = vmul.f32 %v624_v11, %v620_v9 }
   0x9   :  { %v43_v19 = vmul.f32 %v622_v10, %v629_v12  ;;  %v44_v20 = vmul.f32 %v624_v11, %v634_v13  ;;  %v46_v22 = vmul.f32 %v624_v11, %v639_v14  ;;  %v45_v32 = vmul.f32 %v622_v10, %v656_v21 }
   0xa   :  { %v62_v23 = vsel %vm49_vm0, %v48_v16, 0.0  ;;  %v50_v24 = vsel %vm49_vm0, %v42_v18, 0.0  ;;  %v66_v25 = vmul.f32 %v41_v17, %v615_v8  ;;  %v67_v26 = vmul.f32 %v42_v18, %v620_v9 }
   0xb   :  { %v63_v27 = vadd.f32 %v62_v23, %v47_v15  ;;  %v51_v28 = vadd.f32 %v50_v24, %v41_v17  ;;  %v54_v29 = vsel %vm49_vm0, %v44_v20, 0.0  ;;  %v69_v31 = vmul.f32 %v44_v20, %v634_v13 }
   0xc   :  { %v74_v30 = vsel %vm49_vm0, %v67_v26, 0.0  ;;  %v55_v34 = vadd.f32 %v54_v29, %v43_v19  ;;  %v68_v35 = vmul.f32 %v43_v19, %v629_v12  ;;  %v58_v36 = vsel %vm49_vm0, %v46_v22, 0.0 }
   0xd   :  { %64 = vadd.xlane.f32.xlu1 %v63_v27  ;;  %52 = vadd.xlane.f32.xlu0 %v51_v28  ;;  %v75_v33 = vadd.f32 %v74_v30, %v66_v25  ;;  %v78_v37 = vsel %vm49_vm0, %v69_v31, 0.0  ;;  %v73_v38 = vmul.f32 %v48_v16, %v610_v7  ;;  %v71_v39 = vmul.f32 %v46_v22, %v639_v14 }
   0xe   :  { %v59_v40 = vadd.f32 %v58_v36, %v45_v32  ;;  %v79_v41 = vadd.f32 %v78_v37, %v68_v35  ;;  %v72_v42 = vmul.f32 %v47_v15, %v605_v4  ;;  %v70_v43 = vmul.f32 %v45_v32, %v656_v21 }
   0xf   :  { %v86_v44 = vsel %vm49_vm0, %v73_v38, 0.0  ;;  %v82_v45 = vsel %vm49_vm0, %v71_v39, 0.0 }
  0x10   :  { %v87_v46 = vadd.f32 %v86_v44, %v72_v42  ;;  %v83_v47 = vadd.f32 %v82_v45, %v70_v43 }
  0x11   :  { %76 = vadd.xlane.f32.xlu1 %v75_v33  ;;  %56 = vadd.xlane.f32.xlu0 %v55_v34 }
  0x15   :  { %80 = vadd.xlane.f32.xlu1 %v79_v41  ;;  %60 = vadd.xlane.f32.xlu0 %v59_v40 }
  0x19   :  { %88 = vadd.xlane.f32.xlu1 %v87_v46  ;;  %84 = vadd.xlane.f32.xlu0 %v83_v47 }
  0x2a   :  { %141 = vperm.xlu1 %488, %v131_v48  }
  0x2e   :  { %168 = vperm.xlu1 %488, %v162_v49  }
  0x2f   :  { %136 = vperm.xlu0 %487, %v130_v50  }
  0x32   :  { %173 = vperm.xlu1 %488, %v163_v51  }
  0x36   :  { %146 = vperm.xlu1 %488, %v132_v52  }
  0x3a   :  { %151 = vperm.xlu1 %488, %v133_v53  }
  0x3e   :  { %178 = vperm.xlu1 %488, %v164_v54  }
  0x42   :  { %183 = vperm.xlu1 %488, %v165_v55  }
  0x9a   :  { %v65_v56 = vpop.xlane.xlu1 %64  ;;  %v53_v57 = vpop.xlane.xlu0 %52 }
  0x9b   :  { %v90_v58 = vmul.f32 0.0078125, %v53_v57  ;;  %v702_v6 = vmul.f32 0.0078125, %v65_v56 }
  0x9d   :  { %v98_v60 = vmul.f32 %v90_v58, %v90_v58  ;;  %v101_v24 = vmul.f32 %v702_v6, %v702_v6  ;;  %v106_v32 = vsub.f32 %v615_v8, %v90_v58  ;;  %v107_v33 = vsub.f32 %v620_v9, %v90_v58 }
  0x9e   :  { %v77_v59 = vpop.xlane.xlu1 %76  ;;  %v57_v61 = vpop.xlane.xlu0 %56 }
  0x9f   :  { %v94_v62 = vmul.f32 0.0078125, %v77_v59  ;;  %v91_v63 = vmul.f32 0.0078125, %v57_v61 }
  0xa1   :  { %v102_v0 = vsub.f32 %v94_v62, %v98_v60  ;;  %v99_v2 = vmul.f32 %v91_v63, %v91_v63  ;;  %v108_v39 = vsub.f32 %v629_v12, %v91_v63  ;;  %v109_v40 = vsub.f32 %v634_v13, %v91_v63 }
  0xa2   :  { %v81_v3 = vpop.xlane.xlu1 %80  ;;  %v61_v5 = vpop.xlane.xlu0 %60 }
  0xa3   :  { %v114_v15 = vadd.f32 1e-05, %v102_v0  ;;  %v95_v16 = vmul.f32 0.0078125, %v81_v3  ;;  %v92_v17 = vmul.f32 0.0078125, %v61_v5 }
  0xa5   :  { %553 = vrsqrt.f32 %v114_v15  ;;  %v103_v18 = vsub.f32 %v95_v16, %v99_v2  ;;  %v100_v20 = vmul.f32 %v92_v17, %v92_v17  ;;  %v110_v52 = vsub.f32 %v656_v21, %v92_v17 }
  0xa6   :  { %v89_v19 = vpop.xlane.xlu1 %88  ;;  %v85_v22 = vpop.xlane.xlu0 %84  ;;  %v111_v53 = vsub.f32 %v639_v14, %v92_v17  ;;  %v112_v21 = vsub.f32 %v605_v4, %v702_v6  ;;  %v113_v14 = vsub.f32 %v610_v7, %v702_v6 }
  0xa7   :  { %v115_v23 = vadd.f32 1e-05, %v103_v18  ;;  %v97_v25 = vmul.f32 0.0078125, %v89_v19  ;;  %v96_v26 = vmul.f32 0.0078125, %v85_v22 }
  0xa9   :  { %555 = vrsqrt.f32 %v115_v23  ;;  %v105_v27 = vsub.f32 %v97_v25, %v101_v24  ;;  %v104_v28 = vsub.f32 %v96_v26, %v100_v20 }
  0xaa   :  { %v142_v29 = vpop.permute.xlu1 %141 }
  0xab   :  { %v116_v30 = vadd.f32 1e-05, %v104_v28  ;;  %v117_v31 = vadd.f32 1e-05, %v105_v27 }
  0xad   :  { %557 = vrsqrt.f32 %v116_v30 }
  0xae   :  { %v169_v34 = vpop.permute.xlu1 %168  ;;  %v137_v36 = vpop.permute.xlu0 %136  ;;  %559 = vrsqrt.f32 %v117_v31 }
  0xaf   :  { %v554_v35 = vpop.eup %553 }
  0xb0   :  { %v122_v37 = vmul.f32 %v554_v35, %v106_v32  ;;  %v123_v38 = vmul.f32 %v554_v35, %v107_v33 }
  0xb2   :  { %v154_v41 = vmul.f32 %v137_v36, %v122_v37  ;;  %v155_v42 = vmul.f32 %v137_v36, %v123_v38  ;;  %v174_v43 = vpop.permute.xlu1 %173 }
  0xb3   :  { %v556_v44 = vpop.eup %555 }
  0xb4   :  { %v124_v45 = vmul.f32 %v556_v44, %v108_v39  ;;  %v125_v46 = vmul.f32 %v556_v44, %v109_v40  ;;  %v186_v8 = vadd.f32 %v169_v34, %v154_v41  ;;  %v187_v47 = vadd.f32 %v169_v34, %v155_v42 }
  0xb6   :  { %v156_v9 = vmul.f32 %v142_v29, %v124_v45  ;;  %v157_v48 = vmul.f32 %v142_v29, %v125_v46  ;;  %v194_v49 = vmax.f32 %v186_v8, 0.0  ;;  %v195_v50 = vmax.f32 %v187_v47, 0.0  ;;  %v147_v51 = vpop.permute.xlu1 %146 }
  0xb7   :  { %v558_v12 = vpop.eup %557 }
  0xb8   :  { %v202_v13 = vmul.f32 %v194_v49, %v622_v10  ;;  %v203_v54 = vmul.f32 %v195_v50, %v624_v11  ;;  %v188_v55 = vadd.f32 %v174_v43, %v156_v9  ;;  %v189_v56 = vadd.f32 %v174_v43, %v157_v48  ;;  %v560_v59 = vpop.eup %559 }
  0xb9   :  { %v126_v57 = vmul.f32 %v558_v12, %v110_v52  ;;  %v127_v58 = vmul.f32 %v558_v12, %v111_v53  ;;  %v128_v5 = vmul.f32 %v560_v59, %v112_v21  ;;  %v129_v15 = vmul.f32 %v560_v59, %v113_v14 }
  0xba   :  { %211 = vst.msk [vmem:[#allocation2 + $0x8] sm:$0xff] %vm49_vm0, %v203_v54  ;;  %v196_v60 = vmax.f32 %v188_v55, 0.0  ;;  %v197_v61 = vmax.f32 %v189_v56, 0.0  ;;  %v152_v62 = vpop.permute.xlu1 %151 }
  0xbb   :  { %v158_v2 = vmul.f32 %v147_v51, %v126_v57  ;;  %v159_v3 = vmul.f32 %v147_v51, %v127_v58  ;;  %v160_v19 = vmul.f32 %v152_v62, %v128_v5  ;;  %v161_v20 = vmul.f32 %v152_v62, %v129_v15 }
  0xbc   :  { %v204_v63 = vmul.f32 %v196_v60, %v622_v10  ;;  %v205_v0 = vmul.f32 %v197_v61, %v624_v11 }
  0xbe   :  { %213 = vst.msk [vmem:[#allocation2 + $0x18] sm:$0xff] %vm49_vm0, %v205_v0  ;;  %v179_v16 = vpop.permute.xlu1 %178  ;;  %v329_v35 = vpack.c.bf16 %v204_v63, %v202_v13 }
  0xbf   :  { %v190_v17 = vadd.f32 %v179_v16, %v158_v2  ;;  %v191_v18 = vadd.f32 %v179_v16, %v159_v3 }
  0xc1   :  { %v198_v22 = vmax.f32 %v190_v17, 0.0  ;;  %v199_v4 = vmax.f32 %v191_v18, 0.0  ;;  %v219_v23 = vld [vmem:[#allocation2 + $0x8] sm:$0xff] }
  0xc2   :  { %v184_v24 = vpop.permute.xlu1 %183  ;;  %v489_v7 = vpack.i.bf16 %v219_v23, %v202_v13 }
  0xc3   :  { %v206_v6 = vmul.f32 %v198_v22, %v622_v10  ;;  %v207_v25 = vmul.f32 %v199_v4, %v624_v11  ;;  %v192_v26 = vadd.f32 %v184_v24, %v160_v19  ;;  %v193_v27 = vadd.f32 %v184_v24, %v161_v20 }
  0xc4   :  { %490 = vrot.lane.b32.xlu1 %v489_v7, %s562_s2 }
  0xc5   :  { %215 = vst.msk [vmem:[#allocation2 + $0x28] sm:$0xff] %vm49_vm0, %v207_v25  ;;  %v200_v28 = vmax.f32 %v192_v26, 0.0  ;;  %v201_v29 = vmax.f32 %v193_v27, 0.0  ;;  %v221_v30 = vld [vmem:[#allocation2 + $0x18] sm:$0xff] }
  0xc6   :  { %v494_v31 = vpack.i.bf16 %v221_v30, %v204_v63  ;;  %v330_v32 = vpack.c.bf16 %v221_v30, %v219_v23 }
  0xc7   :  { %v208_v33 = vmul.f32 %v200_v28, %v622_v10  ;;  %v209_v34 = vmul.f32 %v201_v29, %v624_v11 }
  0xc8   :  { %495 = vrot.lane.b32.xlu0 %v494_v31, %s562_s2  ;;  %369 = vmatprep.subr.bf16.mxu0 %v330_v32 }
  0xc9   :  { %217 = vst.msk [vmem:[#allocation2 + $0x38] sm:$0xff] %vm49_vm0, %v209_v34  ;;  %467 = vmatprep.subr.bf16.mxu1 %v330_v32  ;;  %370 = vmatpush1.bf16.msra.mxu0 %v329_v35  ;;  %v331_v10 = vpack.c.bf16 %v208_v33, %v206_v6 }
  0xca   :  { %475 = vmatpush1.bf16.msra.mxu1 %v329_v35 }
  0xcc   :  { %v223_v36 = vld [vmem:[#allocation2 + $0x28] sm:$0xff] }
  0xcd   :  { %v499_v37 = vpack.i.bf16 %v223_v36, %v206_v6 }
  0xcf   :  { %500 = vrot.lane.b32.xlu1 %v499_v37, %s562_s2 }
  0xd0   :  { %v225_v38 = vld [vmem:[#allocation2 + $0x38] sm:$0xff] }
  0xd1   :  { %v504_v39 = vpack.i.bf16 %v225_v38, %v208_v33  ;;  %v332_v40 = vpack.c.bf16 %v225_v38, %v223_v36 }
  0xd3   :  { %505 = vrot.lane.b32.xlu0 %v504_v39, %s562_s2  ;;  %510 = vrot.lane.b32.xlu1 %v489_v7, %s563_s3 }
  0xd4   :  { %371 = vmatprep.subr.bf16.mxu0 %v332_v40  ;;  %468 = vmatprep.subr.bf16.mxu1 %v332_v40  ;;  %v550_v40 = vld [vmem:[%s814_s4 + $0x10] sm:$0xff]  }
  0xd5   :  { %372 = vmatpush1.bf16.msra.mxu0 %v331_v10  ;;  %476 = vmatpush1.bf16.msra.mxu1 %v331_v10  ;;  %v551_v10 = vld [vmem:[%s814_s4 + $0x8] sm:$0xff]  }
  0xd7   :  { %515 = vrot.lane.b32.xlu0 %v494_v31, %s563_s3  ;;  %520 = vrot.lane.b32.xlu1 %v499_v37, %s563_s3 }
  0xdb   :  { %525 = vrot.lane.b32.xlu0 %v504_v39, %s563_s3  ;;  %530 = vrot.lane.b32.xlu1 %v489_v7, %s564_s25 }
  0xdf   :  { %535 = vrot.lane.b32.xlu0 %v494_v31, %s564_s25  ;;  %540 = vrot.lane.b32.xlu1 %v499_v37, %s564_s25 }
  0xe3   :  { %545 = vrot.lane.b32.xlu0 %v504_v39, %s564_s25  ;;  %v549_v39 = vld [vmem:[%s814_s4] sm:$0xff]  }
 0x136   :  { %v491_v11 = vpop.permute.xlu1 %490 }
 0x137   :  { %v493_v41 = vunpack.i.h.bf16 %v491_v11  ;;  %v492_v42 = vunpack.i.l.bf16 %v491_v11  ;;  %v552_v11 = vld [vmem:[%s814_s4 + $0x18] sm:$0xff]  }
 0x139   :  { %v251_v8 = vsel %vm250_vm1, %v492_v42, %v493_v41 }
 0x13a   :  { %v496_v43 = vpop.permute.xlu0 %495 }
 0x13b   :  { %v498_v44 = vunpack.i.h.bf16 %v496_v43  ;;  %v497_v45 = vunpack.i.l.bf16 %v496_v43 }
 0x13d   :  { %v334_v46 = vpack.c.bf16 %v498_v44, %v493_v41  ;;  %v252_v47 = vsel %vm250_vm1, %v497_v45, %v498_v44 }
 0x13e   :  { %v333_v9 = vpack.c.bf16 %v252_v47, %v251_v8 }
 0x13f   :  { %373 = vmatprep.subr.bf16.mxu0 %v334_v46  ;;  %469 = vmatprep.subr.bf16.mxu1 %v334_v46 }
 0x140   :  { %374 = vmatpush1.bf16.msra.mxu0 %v333_v9  ;;  %477 = vmatpush1.bf16.msra.mxu1 %v333_v9 }
 0x141   :  { %v501_v48 = vpop.permute.xlu1 %500 }
 0x142   :  { %v503_v49 = vunpack.i.h.bf16 %v501_v48  ;;  %v502_v50 = vunpack.i.l.bf16 %v501_v48 }
 0x144   :  { %v253_v56 = vsel %vm250_vm1, %v502_v50, %v503_v49 }
 0x145   :  { %v511_v51 = vpop.permute.xlu1 %510  ;;  %v506_v52 = vpop.permute.xlu0 %505 }
 0x146   :  { %v508_v53 = vunpack.i.h.bf16 %v506_v52  ;;  %v507_v12 = vunpack.i.l.bf16 %v506_v52  ;;  %v513_v13 = vunpack.i.h.bf16 %v511_v51  ;;  %v512_v54 = vunpack.i.l.bf16 %v511_v51 }
 0x148   :  { %v336_v55 = vpack.c.bf16 %v508_v53, %v503_v49  ;;  %v254_v57 = vsel %vm250_vm1, %v507_v12, %v508_v53  ;;  %v280_v21 = vsel %vm279_vm2, %v512_v54, %v513_v13 }
 0x149   :  { %v521_v58 = vpop.permute.xlu1 %520  ;;  %v516_v59 = vpop.permute.xlu0 %515  ;;  %v335_v60 = vpack.c.bf16 %v254_v57, %v253_v56 }
 0x14a   :  { %v518_v61 = vunpack.i.h.bf16 %v516_v59  ;;  %v517_v62 = vunpack.i.l.bf16 %v516_v59  ;;  %375 = vmatprep.subr.bf16.mxu0 %v336_v55  ;;  %470 = vmatprep.subr.bf16.mxu1 %v336_v55  ;;  %v523_v14 = vunpack.i.h.bf16 %v521_v58  ;;  %v522_v63 = vunpack.i.l.bf16 %v521_v58 }
 0x14b   :  { %376 = vmatpush1.bf16.msra.mxu0 %v335_v60  ;;  %478 = vmatpush1.bf16.msra.mxu1 %v335_v60 }
 0x14c   :  { %v338_v0 = vpack.c.bf16 %v518_v61, %v513_v13  ;;  %v281_v2 = vsel %vm279_vm2, %v517_v62, %v518_v61  ;;  %v282_v22 = vsel %vm279_vm2, %v522_v63, %v523_v14 }
 0x14d   :  { %v531_v3 = vpop.permute.xlu1 %530  ;;  %v526_v5 = vpop.permute.xlu0 %525  ;;  %v337_v15 = vpack.c.bf16 %v281_v2, %v280_v21 }
 0x14e   :  { %v528_v16 = vunpack.i.h.bf16 %v526_v5  ;;  %v527_v17 = vunpack.i.l.bf16 %v526_v5  ;;  %377 = vmatprep.subr.bf16.mxu0 %v338_v0  ;;  %471 = vmatprep.subr.bf16.mxu1 %v338_v0  ;;  %v533_v18 = vunpack.i.h.bf16 %v531_v3  ;;  %v532_v19 = vunpack.i.l.bf16 %v531_v3 }
 0x14f   :  { %378 = vmatpush1.bf16.msra.mxu0 %v337_v15  ;;  %479 = vmatpush1.bf16.msra.mxu1 %v337_v15 }
 0x150   :  { %v340_v20 = vpack.c.bf16 %v528_v16, %v523_v14  ;;  %v283_v4 = vsel %vm279_vm2, %v527_v17, %v528_v16  ;;  %v309_v26 = vsel %vm308_vm3, %v532_v19, %v533_v18 }
 0x151   :  { %v541_v23 = vpop.permute.xlu1 %540  ;;  %v536_v24 = vpop.permute.xlu0 %535  ;;  %v339_v7 = vpack.c.bf16 %v283_v4, %v282_v22 }
 0x152   :  { %v538_v6 = vunpack.i.h.bf16 %v536_v24  ;;  %v537_v25 = vunpack.i.l.bf16 %v536_v24  ;;  %379 = vmatprep.subr.bf16.mxu0 %v340_v20  ;;  %472 = vmatprep.subr.bf16.mxu1 %v340_v20  ;;  %v543_v27 = vunpack.i.h.bf16 %v541_v23  ;;  %v542_v28 = vunpack.i.l.bf16 %v541_v23 }
 0x153   :  { %380 = vmatpush1.bf16.msra.mxu0 %v339_v7  ;;  %480 = vmatpush1.bf16.msra.mxu1 %v339_v7 }
 0x154   :  { %v342_v29 = vpack.c.bf16 %v538_v6, %v533_v18  ;;  %v310_v30 = vsel %vm308_vm3, %v537_v25, %v538_v6  ;;  %v311_v36 = vsel %vm308_vm3, %v542_v28, %v543_v27 }
 0x155   :  { %v546_v31 = vpop.permute.xlu0 %545  ;;  %v341_v32 = vpack.c.bf16 %v310_v30, %v309_v26 }
 0x156   :  { %v548_v33 = vunpack.i.h.bf16 %v546_v31  ;;  %v547_v34 = vunpack.i.l.bf16 %v546_v31  ;;  %381 = vmatprep.subr.bf16.mxu0 %v342_v29  ;;  %473 = vmatprep.subr.bf16.mxu1 %v342_v29 }
 0x157   :  { %382 = vmatpush1.bf16.msra.mxu0 %v341_v32  ;;  %481 = vmatpush1.bf16.msra.mxu1 %v341_v32 }
 0x158   :  { %v344_v35 = vpack.c.bf16 %v548_v33, %v543_v27  ;;  %v312_v37 = vsel %vm308_vm3, %v547_v34, %v548_v33 }
 0x159   :  { %v343_v38 = vpack.c.bf16 %v312_v37, %v311_v36 }
 0x15a   :  { %383 = vmatprep.subr.bf16.mxu0 %v344_v35  ;;  %474 = vmatprep.subr.bf16.mxu1 %v344_v35 }
 0x15b   :  { %384 = vmatpush1.bf16.msra.mxu0 %v343_v38  ;;  %482 = vmatpush1.bf16.msra.mxu1 %v343_v38 }
 0x15e   :  { %402 = vmatmul.mubr.bf16.vlgmr.msra.gmra.mrb[0].mxu0 %v549_v39  ;;  %422 = vmatmul.mubr.bf16.vlgmr.msra.gmra.mrb[0].mxu1 %v550_v40 }
 0x15f   :  { %411 = vmatprep.mubr.bf16.mxu0 %v561_v1  ;;  %431 = vmatprep.mubr.bf16.mxu1 %v561_v1 }
 0x166   :  { %412 = vmatmul.mubr.bf16.gmra.mrb[4].mxu0 %v551_v10  ;;  %432 = vmatmul.mubr.bf16.gmra.mrb[4].mxu1 %v552_v11 }
 0x231   :  { %v403_v41 = vpop.f32.mrb[0].mxu0  ;;  %v423_v42 = vpop.f32.mrb[0].mxu1 }
 0x232   :  { %442 = vst [vmem:[%s815_s5] sm:$0xff] %v403_v41  ;;  %451 = vst [vmem:[%s815_s5 + $0x40] sm:$0xff] %v423_v42  ;;  %v405_v1 = vpop.f32.mrb[1].mxu0  ;;  %v425_v43 = vpop.f32.mrb[1].mxu1 }
 0x233   :  { %444 = vst.msk [vmem:[%s815_s5 + $0x8] sm:$0xff] %vm443_vm4, %v405_v1  ;;  %452 = vst.msk [vmem:[%s815_s5 + $0x48] sm:$0xff] %vm443_vm4, %v425_v43  ;;  %v407_v44 = vpop.f32.mrb[2].mxu0  ;;  %v427_v45 = vpop.f32.mrb[2].mxu1 }
 0x234   :  { %445 = vst [vmem:[%s815_s5 + $0x10] sm:$0xff] %v407_v44  ;;  %453 = vst [vmem:[%s815_s5 + $0x50] sm:$0xff] %v427_v45  ;;  %v409_v46 = vpop.f32.mrb[3].mxu0  ;;  %v429_v8 = vpop.f32.mrb[3].mxu1 }
 0x235   :  { %446 = vst.msk [vmem:[%s815_s5 + $0x18] sm:$0xff] %vm443_vm4, %v409_v46  ;;  %454 = vst.msk [vmem:[%s815_s5 + $0x58] sm:$0xff] %vm443_vm4, %v429_v8 }
 0x239   :  { %v413_v47 = vpop.f32.mrb[4].mxu0  ;;  %v433_v9 = vpop.f32.mrb[4].mxu1 }
 0x23a   :  { %447 = vst [vmem:[%s815_s5 + $0x20] sm:$0xff] %v413_v47  ;;  %455 = vst [vmem:[%s815_s5 + $0x60] sm:$0xff] %v433_v9  ;;  %v415_v48 = vpop.f32.mrb[5].mxu0  ;;  %v435_v49 = vpop.f32.mrb[5].mxu1 }
 0x23b   :  { %448 = vst.msk [vmem:[%s815_s5 + $0x28] sm:$0xff] %vm443_vm4, %v415_v48  ;;  %456 = vst.msk [vmem:[%s815_s5 + $0x68] sm:$0xff] %vm443_vm4, %v435_v49  ;;  %v417_v50 = vpop.f32.mrb[6].mxu0  ;;  %v437_v51 = vpop.f32.mrb[6].mxu1 }
 0x23c   :  { %449 = vst [vmem:[%s815_s5 + $0x30] sm:$0xff] %v417_v50  ;;  %457 = vst [vmem:[%s815_s5 + $0x70] sm:$0xff] %v437_v51  ;;  %v419_v52 = vpop.f32.mrb[7].mxu0  ;;  %v439_v53 = vpop.f32.mrb[7].mxu1 }
 0x23d   :  { %450 = vst.msk [vmem:[%s815_s5 + $0x38] sm:$0xff] %vm443_vm4, %v419_v52  ;;  %458 = vst.msk [vmem:[%s815_s5 + $0x78] sm:$0xff] %vm443_vm4, %v439_v53 }

// kernel: generator_forward.7
= control target key start
LH: loop header
LB: loop body
LE: loop exit
PB: predicated region body
PF: predicated region fallthrough
CT: control target
= control target key end

     0   :  { %v33_v0 = vlaneseq  ;;  %v635_v1 = vmov 0   ;;  %vm71_vm0 = vcmask 277504   ;;  %s638_s21 = smov 111   ;;  %vm253_vm1 = vcmask 1039360   ;;  %s896_s1 = inlined_call_operand.vmem [shape: f32[1,546], index: 1, kind: input, shape index: {}]   ;;  %s897_s0 = inlined_call_operand.vmem [shape: f32[16,546], index: 0, kind: input, shape index: {}]   ;;  %s898_s2 = inlined_call_operand.vmem [shape: f32[16,1], index: 2, kind: input, shape index: {}]   ;;  %s899_s3 = inlined_call_operand.vmem [shape: f32[16,1], index: 3, kind: input, shape index: {}]   ;;  %s900_s4 = inlined_call_operand.vmem [shape: bf16[4,64], index: 4, kind: input, shape index: {}]   ;;  %s901_s5 = inlined_call_operand.vmem [shape: f32[4,529], index: 5, kind: output, shape index: {}]  }
   0x1   :  { %545 = vset.pattern.permute.xlu1 %v635_v1  ;;  %544 = vset.pattern.permute.xlu0 %v635_v1  ;;  %v31_v3 = vld [vmem:[%s896_s1] sm:$0x1f]  ;;  %v682_v5 = vld [vmem:[%s897_s0 + $0x8] sm:$0xff]  ;;  %v687_v10 = vld [vmem:[%s897_s0 + $0x10] sm:$0xff]  ;;  %vm292_vm2 = vcmask 916480   ;;  %vm331_vm3 = vcmask 908288  }
   0x2   :  { %v34_v2 = vshrl.u32 %v33_v0, 7  ;;  %407 = vmatprep.mubr.bf16.mxu0 %v635_v1  ;;  %448 = vmatprep.mubr.bf16.mxu1 %v635_v1  ;;  %v677_v4 = vld [vmem:[%s897_s0] sm:$0xff]  ;;  %v692_v11 = vld [vmem:[%s897_s0 + $0x18] sm:$0xff]  ;;  %v710_v18 = vld [vmem:[%s897_s0 + $0x28] sm:$0xff]  ;;  %vm371_vm4 = vcmask 523264   ;;  %vm640_vm5 = vmmov 0  }
   0x3   :  { %v697_v12 = vld [vmem:[%s897_s0 + $0x20] sm:$0xff]  ;;  %v715_v19 = vld [vmem:[%s897_s0 + $0x30] sm:$0xff]  ;;  %v720_v20 = vld [vmem:[%s897_s0 + $0x38] sm:$0xff]  ;;  %vm512_vm6 = vcmask 134144  }
   0x4   :  { %v35_v6 = vsub.s32 0, %v34_v2  ;;  %v39_v7 = vsub.s32 1, %v34_v2  ;;  %v43_v8 = vsub.s32 2, %v34_v2  ;;  %v47_v9 = vsub.s32 3, %v34_v2  ;;  %v735_v26 = vld [vmem:[%s897_s0 + $0x40] sm:$0xff]  ;;  %v742_v28 = vld [vmem:[%s897_s0 + $0x48] sm:$0xff] }
   0x5   :  { %v51_v13 = vsub.s32 4, %v34_v2  ;;  %v140_v0 = vld [vmem:[%s898_s2 + $0x8] sm:$0xff]  ;;  %v139_v1 = vld [vmem:[%s898_s2] sm:$0xff]  ;;  %s636_s2 = smov 112  }
   0x6   :  { %v699_v14 = vrot.slane %v31_v3, %v35_v6  ;;  %v701_v15 = vrot.slane %v31_v3, %v39_v7  ;;  %v703_v16 = vrot.slane %v31_v3, %v43_v8  ;;  %v705_v17 = vrot.slane %v31_v3, %v47_v9  ;;  %v161_v2 = vld [vmem:[%s899_s3] sm:$0xff] }
   0x7   :  { %v722_v21 = vrot.slane %v31_v3, %v51_v13  ;;  %v162_v3 = vld [vmem:[%s899_s3 + $0x8] sm:$0xff]  ;;  %s637_s3 = smov 127  }
   0x8   :  { %v58_v22 = vmul.f32 %v699_v14, %v677_v4  ;;  %v59_v23 = vmul.f32 %v701_v15, %v682_v5  ;;  %v60_v24 = vmul.f32 %v703_v16, %v687_v10  ;;  %v61_v25 = vmul.f32 %v705_v17, %v692_v11 }
   0x9   :  { %v62_v27 = vmul.f32 %v722_v21, %v697_v12  ;;  %v63_v29 = vmul.f32 %v699_v14, %v710_v18  ;;  %v64_v30 = vmul.f32 %v701_v15, %v715_v19  ;;  %v65_v31 = vmul.f32 %v703_v16, %v720_v20 }
   0xa   :  { %v68_v32 = vadd.f32 %v59_v23, %v58_v22  ;;  %v83_v33 = vmul.f32 %v58_v22, %v677_v4  ;;  %v84_v34 = vmul.f32 %v59_v23, %v682_v5  ;;  %v85_v35 = vmul.f32 %v60_v24, %v687_v10 }
   0xb   :  { %v86_v36 = vmul.f32 %v61_v25, %v692_v11  ;;  %v87_v37 = vmul.f32 %v62_v27, %v697_v12  ;;  %v66_v38 = vmul.f32 %v705_v17, %v735_v26  ;;  %v67_v41 = vmul.f32 %v722_v21, %v742_v28 }
   0xc   :  { %v69_v39 = vadd.f32 %v68_v32, %v60_v24  ;;  %v93_v40 = vadd.f32 %v84_v34, %v83_v33  ;;  %v76_v42 = vadd.f32 %v64_v30, %v63_v29  ;;  %v72_v43 = vsel %vm71_vm0, %v62_v27, 0.0 }
   0xd   :  { %v88_v44 = vmul.f32 %v63_v29, %v710_v18  ;;  %v89_v45 = vmul.f32 %v64_v30, %v715_v19  ;;  %v90_v46 = vmul.f32 %v65_v31, %v720_v20  ;;  %v96_v49 = vsel %vm71_vm0, %v87_v37, 0.0 }
   0xe   :  { %v70_v47 = vadd.f32 %v69_v39, %v61_v25  ;;  %v94_v48 = vadd.f32 %v93_v40, %v85_v35  ;;  %v77_v50 = vadd.f32 %v76_v42, %v65_v31  ;;  %v79_v51 = vsel %vm71_vm0, %v67_v41, 0.0 }
   0xf   :  { %v91_v52 = vmul.f32 %v66_v38, %v735_v26  ;;  %v92_v53 = vmul.f32 %v67_v41, %v742_v28  ;;  %v100_v54 = vadd.f32 %v89_v45, %v88_v44 }
  0x10   :  { %v73_v55 = vadd.f32 %v72_v43, %v70_v47  ;;  %v95_v56 = vadd.f32 %v94_v48, %v86_v36  ;;  %v78_v57 = vadd.f32 %v77_v50, %v66_v38 }
  0x11   :  { %v101_v58 = vadd.f32 %v100_v54, %v90_v46  ;;  %v103_v61 = vsel %vm71_vm0, %v92_v53, 0.0 }
  0x12   :  { %74 = vadd.xlane.f32.xlu0 %v73_v55  ;;  %v97_v59 = vadd.f32 %v96_v49, %v95_v56  ;;  %v80_v60 = vadd.f32 %v79_v51, %v78_v57 }
  0x13   :  { %v102_v62 = vadd.f32 %v101_v58, %v91_v52 }
  0x14   :  { %98 = vadd.xlane.f32.xlu1 %v97_v59 }
  0x15   :  { %v104_v63 = vadd.f32 %v103_v61, %v102_v62 }
  0x16   :  { %81 = vadd.xlane.f32.xlu0 %v80_v60 }
  0x18   :  { %105 = vadd.xlane.f32.xlu1 %v104_v63 }
  0x29   :  { %148 = vperm.xlu1 %545, %v140_v0  }
  0x2c   :  { %143 = vperm.xlu0 %544, %v139_v1  }
  0x2d   :  { %165 = vperm.xlu1 %545, %v161_v2  }
  0x31   :  { %170 = vperm.xlu1 %545, %v162_v3  }
  0x9f   :  { %v75_v6 = vpop.xlane.xlu0 %74 }
  0xa0   :  { %v107_v7 = vmul.f32 0.001953125, %v75_v6 }
  0xa1   :  { %v99_v8 = vpop.xlane.xlu1 %98 }
  0xa2   :  { %v109_v9 = vmul.f32 0.001953125, %v99_v8  ;;  %v111_v13 = vmul.f32 %v107_v7, %v107_v7  ;;  %v115_v34 = vsub.f32 %v677_v4, %v107_v7  ;;  %v116_v35 = vsub.f32 %v682_v5, %v107_v7 }
  0xa3   :  { %v82_v22 = vpop.xlane.xlu0 %81  ;;  %v117_v36 = vsub.f32 %v687_v10, %v107_v7  ;;  %v118_v37 = vsub.f32 %v692_v11, %v107_v7  ;;  %v119_v39 = vsub.f32 %v697_v12, %v107_v7 }
  0xa4   :  { %v113_v23 = vsub.f32 %v109_v9, %v111_v13  ;;  %v108_v24 = vmul.f32 0.001953125, %v82_v22 }
  0xa5   :  { %v106_v25 = vpop.xlane.xlu1 %105 }
  0xa6   :  { %v125_v27 = vadd.f32 1e-05, %v113_v23  ;;  %v110_v29 = vmul.f32 0.001953125, %v106_v25  ;;  %v112_v30 = vmul.f32 %v108_v24, %v108_v24  ;;  %v120_v45 = vsub.f32 %v710_v18, %v108_v24 }
  0xa7   :  { %v121_v46 = vsub.f32 %v715_v19, %v108_v24  ;;  %v122_v4 = vsub.f32 %v720_v20, %v108_v24  ;;  %v123_v10 = vsub.f32 %v735_v26, %v108_v24  ;;  %v124_v12 = vsub.f32 %v742_v28, %v108_v24 }
  0xa8   :  { %621 = vrsqrt.f32 %v125_v27  ;;  %v114_v31 = vsub.f32 %v110_v29, %v112_v30 }
  0xa9   :  { %v149_v33 = vpop.permute.xlu1 %148 }
  0xaa   :  { %v126_v32 = vadd.f32 1e-05, %v114_v31 }
  0xab   :  { %v144_v40 = vpop.permute.xlu0 %143 }
  0xac   :  { %623 = vrsqrt.f32 %v126_v32 }
  0xad   :  { %v166_v47 = vpop.permute.xlu1 %165 }
  0xb1   :  { %v171_v62 = vpop.permute.xlu1 %170 }
  0xb2   :  { %v622_v38 = vpop.eup %621 }
  0xb3   :  { %v129_v41 = vmul.f32 %v622_v38, %v115_v34  ;;  %v130_v42 = vmul.f32 %v622_v38, %v116_v35  ;;  %v131_v43 = vmul.f32 %v622_v38, %v117_v36  ;;  %v132_v44 = vmul.f32 %v622_v38, %v118_v37 }
  0xb4   :  { %v133_v5 = vmul.f32 %v622_v38, %v119_v39 }
  0xb5   :  { %v151_v48 = vmul.f32 %v144_v40, %v129_v41  ;;  %v152_v11 = vmul.f32 %v144_v40, %v130_v42  ;;  %v153_v49 = vmul.f32 %v144_v40, %v131_v43  ;;  %v154_v51 = vmul.f32 %v144_v40, %v132_v44 }
  0xb6   :  { %v624_v50 = vpop.eup %623  ;;  %v155_v52 = vmul.f32 %v144_v40, %v133_v5 }
  0xb7   :  { %v134_v53 = vmul.f32 %v624_v50, %v120_v45  ;;  %v135_v54 = vmul.f32 %v624_v50, %v121_v46  ;;  %v136_v55 = vmul.f32 %v624_v50, %v122_v4  ;;  %v137_v18 = vmul.f32 %v624_v50, %v123_v10 }
  0xb8   :  { %v138_v56 = vmul.f32 %v624_v50, %v124_v12  ;;  %v173_v19 = vadd.f32 %v166_v47, %v151_v48  ;;  %v174_v57 = vadd.f32 %v166_v47, %v152_v11  ;;  %v175_v20 = vadd.f32 %v166_v47, %v153_v49 }
  0xb9   :  { %v156_v58 = vmul.f32 %v149_v33, %v134_v53  ;;  %v157_v59 = vmul.f32 %v149_v33, %v135_v54  ;;  %v158_v60 = vmul.f32 %v149_v33, %v136_v55  ;;  %v159_v26 = vmul.f32 %v149_v33, %v137_v18 }
  0xba   :  { %v160_v61 = vmul.f32 %v149_v33, %v138_v56  ;;  %v176_v63 = vadd.f32 %v166_v47, %v154_v51  ;;  %v177_v0 = vadd.f32 %v166_v47, %v155_v52  ;;  %v183_v1 = vmax.f32 %v173_v19, 0.0 }
  0xbb   :  { %v178_v28 = vadd.f32 %v171_v62, %v156_v58  ;;  %v179_v2 = vadd.f32 %v171_v62, %v157_v59  ;;  %v180_v3 = vadd.f32 %v171_v62, %v158_v60  ;;  %v181_v6 = vadd.f32 %v171_v62, %v159_v26 }
  0xbc   :  { %v182_v7 = vadd.f32 %v171_v62, %v160_v61  ;;  %v184_v8 = vmax.f32 %v174_v57, 0.0  ;;  %v185_v9 = vmax.f32 %v175_v20, 0.0  ;;  %v186_v13 = vmax.f32 %v176_v63, 0.0 }
  0xbd   :  { %v188_v22 = vmax.f32 %v178_v28, 0.0  ;;  %v189_v23 = vmax.f32 %v179_v2, 0.0  ;;  %v190_v24 = vmax.f32 %v180_v3, 0.0  ;;  %v191_v25 = vmax.f32 %v181_v6, 0.0 }
  0xbe   :  { %v192_v27 = vmax.f32 %v182_v7, 0.0  ;;  %v187_v29 = vmax.f32 %v177_v0, 0.0  ;;  %v193_v30 = vmul.f32 %v183_v1, %v699_v14  ;;  %v194_v31 = vmul.f32 %v184_v8, %v701_v15 }
  0xbf   :  { %v198_v32 = vmul.f32 %v188_v22, %v699_v14  ;;  %v199_v33 = vmul.f32 %v189_v23, %v701_v15  ;;  %v200_v34 = vmul.f32 %v190_v24, %v703_v16  ;;  %v201_v35 = vmul.f32 %v191_v25, %v705_v17 }
  0xc0   :  { %v202_v36 = vmul.f32 %v192_v27, %v722_v21  ;;  %v195_v37 = vmul.f32 %v185_v9, %v703_v16  ;;  %v196_v38 = vmul.f32 %v186_v13, %v705_v17  ;;  %v197_v39 = vmul.f32 %v187_v29, %v722_v21 }
  0xc1   :  { %v352_v40 = vpack.c.bf16 %v199_v33, %v194_v31  ;;  %v571_v41 = vpack.i.bf16 %v198_v32, %v193_v30  ;;  %v351_v42 = vpack.c.bf16 %v198_v32, %v193_v30  ;;  %v551_v16 = vpack.i.bf16 %v200_v34, %v199_v33 }
  0xc2   :  { %212 = vst.msk [vmem:[#allocation2 + $0x48] sm:$0xff] %vm71_vm0, %v202_v36  ;;  %207 = vst.msk [vmem:[#allocation2 + $0x20] sm:$0xff] %vm71_vm0, %v197_v39  ;;  %v546_v14 = vpack.i.bf16 %v195_v37, %v194_v31  ;;  %v354_v15 = vpack.c.bf16 %v201_v35, %v196_v38  ;;  %v353_v43 = vpack.c.bf16 %v200_v34, %v195_v37 }
  0xc3   :  { %375 = vmatprep.subr.bf16.mxu0 %v352_v40  ;;  %572 = vrot.lane.b32.xlu0 %v571_v41, %s636_s2 }
  0xc4   :  { %547 = vrot.lane.b32.xlu1 %v546_v14, %s637_s3  ;;  %416 = vmatprep.subr.bf16.mxu1 %v354_v15  ;;  %v639_v15 = vmov 0.0  }
  0xc5   :  { %376 = vmatpush1.bf16.msra.mxu0 %v351_v42  ;;  %417 = vmatpush1.bf16.msra.mxu1 %v353_v43  ;;  %v350_v42 = vld [vmem:[%s900_s4] sm:$0x3] }
  0xc7   :  { %582 = vrot.lane.b32.xlu0 %v551_v16, %s638_s21 }
  0xc8   :  { %552 = vrot.lane.b32.xlu1 %v551_v16, %s637_s3 }
  0xc9   :  { %v802_v17 = vld [vmem:[#allocation2 + $0x20] sm:$0xff]  ;;  %v804_v21 = vld [vmem:[#allocation2 + $0x48] sm:$0xff] }
  0xca   :  { %v591_v44 = vpack.i.bf16 %v802_v17, %v196_v38  ;;  %v355_v45 = vpack.c.bf16 %v804_v21, %v802_v17  ;;  %v596_v46 = vpack.i.bf16 %v804_v21, %v201_v35 }
  0xcc   :  { %557 = vrot.lane.b32.xlu1 %v571_v41, %s637_s3  ;;  %592 = vrot.lane.b32.xlu0 %v591_v44, %s637_s3 }
  0xd0   :  { %562 = vrot.lane.b32.xlu1 %v546_v14, %s636_s2  ;;  %602 = vrot.lane.b32.xlu0 %v591_v44, %s636_s2 }
  0xd4   :  { %567 = vrot.lane.b32.xlu1 %v551_v16, %s636_s2  ;;  %612 = vrot.lane.b32.xlu0 %v591_v44, %s638_s21 }
  0xd8   :  { %577 = vrot.lane.b32.xlu1 %v546_v14, %s638_s21 }
  0xdc   :  { %587 = vrot.lane.b32.xlu1 %v571_v41, %s638_s21 }
  0xe0   :  { %597 = vrot.lane.b32.xlu1 %v596_v46, %s637_s3 }
  0xe4   :  { %607 = vrot.lane.b32.xlu1 %v596_v46, %s636_s2 }
  0xe8   :  { %617 = vrot.lane.b32.xlu1 %v596_v46, %s638_s21 }
 0x135   :  { %v573_v49 = vpop.permute.xlu0 %572 }
 0x136   :  { %v810_v4 = vpop.permute.xlu1 %547  ;;  %v575_v60 = vunpack.i.h.bf16 %v573_v49  ;;  %v574_v26 = vunpack.i.l.bf16 %v573_v49 }
 0x137   :  { %v550_v47 = vunpack.i.h.bf16 %v810_v4  ;;  %v549_v5 = vunpack.i.l.bf16 %v810_v4 }
 0x139   :  { %v255_v50 = vsel %vm253_vm1, %v549_v5, %v550_v47  ;;  %v828_v57 = vpop.permute.xlu0 %582 }
 0x13a   :  { %v814_v10 = vpop.permute.xlu1 %552  ;;  %v585_v63 = vunpack.i.h.bf16 %v828_v57  ;;  %v584_v0 = vunpack.i.l.bf16 %v828_v57 }
 0x13b   :  { %v555_v48 = vunpack.i.h.bf16 %v814_v10  ;;  %v554_v11 = vunpack.i.l.bf16 %v814_v10 }
 0x13c   :  { %v337_v24 = vsel %vm331_vm3, %v584_v0, %v585_v63 }
 0x13d   :  { %v259_v12 = vsel %vm253_vm1, %v554_v11, %v555_v48 }
 0x13e   :  { %v558_v51 = vpop.permute.xlu1 %557  ;;  %v357_v52 = vpack.c.bf16 %v259_v12, %v255_v50  ;;  %v593_v1 = vpop.permute.xlu0 %592 }
 0x13f   :  { %v560_v53 = vunpack.i.h.bf16 %v558_v51  ;;  %v559_v54 = vunpack.i.l.bf16 %v558_v51  ;;  %v595_v32 = vunpack.i.h.bf16 %v593_v1  ;;  %v594_v33 = vunpack.i.l.bf16 %v593_v1 }
 0x140   :  { %377 = vmatprep.subr.bf16.mxu0 %v357_v52 }
 0x141   :  { %v254_v55 = vsel %vm253_vm1, %v559_v54, %v549_v5  ;;  %v258_v18 = vsel %vm253_vm1, %v560_v53, %v554_v11  ;;  %v257_v43 = vsel %vm253_vm1, %v594_v33, %v595_v32  ;;  %v256_v44 = vsel %vm253_vm1, %v550_v47, %v594_v33 }
 0x142   :  { %v826_v56 = vpop.permute.xlu1 %562  ;;  %v356_v19 = vpack.c.bf16 %v258_v18, %v254_v55  ;;  %v603_v29 = vpop.permute.xlu0 %602 }
 0x143   :  { %v565_v20 = vunpack.i.h.bf16 %v826_v56  ;;  %v564_v58 = vunpack.i.l.bf16 %v826_v56  ;;  %v605_v40 = vunpack.i.h.bf16 %v603_v29  ;;  %v604_v41 = vunpack.i.l.bf16 %v603_v29 }
 0x144   :  { %378 = vmatpush1.bf16.msra.mxu0 %v356_v19 }
 0x145   :  { %v294_v28 = vsel %vm292_vm2, %v564_v58, %v565_v20  ;;  %v293_v3 = vsel %vm292_vm2, %v574_v26, %v564_v58  ;;  %v296_v4 = vsel %vm292_vm2, %v604_v41, %v605_v40  ;;  %v295_v10 = vsel %vm292_vm2, %v565_v20, %v604_v41 }
 0x146   :  { %v832_v59 = vpop.permute.xlu1 %567  ;;  %v613_v14 = vpop.permute.xlu0 %612 }
 0x147   :  { %v570_v61 = vunpack.i.h.bf16 %v832_v59  ;;  %v569_v62 = vunpack.i.l.bf16 %v832_v59  ;;  %v615_v51 = vunpack.i.h.bf16 %v613_v14  ;;  %v614_v52 = vunpack.i.l.bf16 %v613_v14 }
 0x149   :  { %v298_v2 = vsel %vm292_vm2, %v569_v62, %v570_v61  ;;  %v297_v6 = vsel %vm292_vm2, %v575_v60, %v569_v62 }
 0x14a   :  { %v844_v7 = vpop.permute.xlu1 %577  ;;  %v362_v8 = vpack.c.bf16 %v298_v2, %v294_v28  ;;  %v361_v9 = vpack.c.bf16 %v297_v6, %v293_v3 }
 0x14b   :  { %v580_v13 = vunpack.i.h.bf16 %v844_v7  ;;  %v579_v22 = vunpack.i.l.bf16 %v844_v7 }
 0x14c   :  { %379 = vmatprep.subr.bf16.mxu0 %v362_v8 }
 0x14d   :  { %380 = vmatpush1.bf16.msra.mxu0 %v361_v9  ;;  %v333_v23 = vsel %vm331_vm3, %v579_v22, %v580_v13  ;;  %v334_v19 = vsel %vm331_vm3, %v580_v13, %v614_v52 }
 0x14e   :  { %v588_v25 = vpop.permute.xlu1 %587  ;;  %v367_v27 = vpack.c.bf16 %v337_v24, %v333_v23 }
 0x14f   :  { %v590_v30 = vunpack.i.h.bf16 %v588_v25  ;;  %v589_v31 = vunpack.i.l.bf16 %v588_v25 }
 0x150   :  { %381 = vmatprep.subr.bf16.mxu0 %v367_v27 }
 0x151   :  { %v332_v34 = vsel %vm331_vm3, %v589_v31, %v579_v22  ;;  %v336_v35 = vsel %vm331_vm3, %v590_v30, %v584_v0 }
 0x152   :  { %v598_v36 = vpop.permute.xlu1 %597  ;;  %v366_v37 = vpack.c.bf16 %v336_v35, %v332_v34 }
 0x153   :  { %v600_v38 = vunpack.i.h.bf16 %v598_v36  ;;  %v599_v39 = vunpack.i.l.bf16 %v598_v36 }
 0x154   :  { %382 = vmatpush1.bf16.msra.mxu0 %v366_v37 }
 0x155   :  { %526 = vmatprep.subr.bf16.mxu0 %v639_v15  ;;  %v261_v16 = vsel %vm253_vm1, %v599_v39, %v600_v38  ;;  %v260_v46 = vsel %vm253_vm1, %v555_v48, %v599_v39  ;;  %v360_v53 = vpack.c.bf16 %v600_v38, %v595_v32 }
 0x156   :  { %v608_v5 = vpop.permute.xlu1 %607  ;;  %v359_v11 = vpack.c.bf16 %v261_v16, %v257_v43  ;;  %v358_v49 = vpack.c.bf16 %v260_v46, %v256_v44 }
 0x157   :  { %v610_v50 = vunpack.i.h.bf16 %v608_v5  ;;  %v609_v12 = vunpack.i.l.bf16 %v608_v5  ;;  %518 = vmatmul.mubr.msk.bf16.vlgmr.msra.gmra.mrb[0].mxu0 %vm371_vm4, %v350_v42 }
 0x158   :  { %418 = vmatprep.subr.bf16.mxu1 %v359_v11  ;;  %527 = vmatpush3.bf16.msra.mxu0 %v355_v45  ;;  %v335_v45 = vsel %vm331_vm3, %v614_v52, %v615_v51 }
 0x159   :  { %419 = vmatpush1.bf16.msra.mxu1 %v358_v49  ;;  %528 = vmatprep.subr.bf16.mxu0 %v639_v15  ;;  %v300_v47 = vsel %vm292_vm2, %v609_v12, %v610_v50  ;;  %v299_v48 = vsel %vm292_vm2, %v570_v61, %v609_v12  ;;  %v365_v58 = vpack.c.bf16 %v610_v50, %v605_v40 }
 0x15a   :  { %v618_v54 = vpop.permute.xlu1 %617  ;;  %v364_v55 = vpack.c.bf16 %v300_v47, %v296_v4  ;;  %v363_v18 = vpack.c.bf16 %v299_v48, %v295_v10  ;;  %534 = vmatprep.mubr.msk.bf16.mxu0 %vm640_vm5, %v639_v15 }
 0x15b   :  { %v620_v17 = vunpack.i.h.bf16 %v618_v54  ;;  %v619_v21 = vunpack.i.l.bf16 %v618_v54 }
 0x15c   :  { %420 = vmatprep.subr.bf16.mxu1 %v364_v55  ;;  %529 = vmatpush3.bf16.msra.mxu0 %v360_v53 }
 0x15d   :  { %421 = vmatpush1.bf16.msra.mxu1 %v363_v18  ;;  %530 = vmatprep.subr.bf16.mxu0 %v639_v15  ;;  %v339_v56 = vsel %vm331_vm3, %v619_v21, %v620_v17  ;;  %v338_v20 = vsel %vm331_vm3, %v585_v63, %v619_v21  ;;  %v370_v26 = vpack.c.bf16 %v620_v17, %v615_v51 }
 0x15e   :  { %v369_v59 = vpack.c.bf16 %v339_v56, %v335_v45  ;;  %v368_v60 = vpack.c.bf16 %v338_v20, %v334_v19 }
 0x160   :  { %422 = vmatprep.subr.bf16.mxu1 %v369_v59  ;;  %531 = vmatpush3.bf16.msra.mxu0 %v365_v58 }
 0x161   :  { %423 = vmatpush1.bf16.msra.mxu1 %v368_v60  ;;  %532 = vmatprep.subr.bf16.mxu0 %v639_v15 }
 0x164   :  { %519 = vmatmul.mubr.msk.bf16.vlgmr.msra.gmra.mrb[0].mxu1 %vm371_vm4, %v350_v42  ;;  %533 = vmatpush3.bf16.msra.mxu0 %v370_v26 }
 0x167   :  { %535 = vmatmul.mubr.msk.bf16.vlgmr.msra.gmra.mrb[4].mxu0 %vm371_vm4, %v350_v42 }
 0x22a   :  { %v409_v61 = vpop.f32.mrb[0].mxu0 }
 0x22b   :  { %625 = vtanh.f32 %v409_v61  ;;  %v411_v62 = vpop.f32.mrb[1].mxu0 }
 0x22c   :  { %627 = vtanh.f32 %v411_v62  ;;  %v413_v57 = vpop.f32.mrb[2].mxu0 }
 0x22d   :  { %v414_v0 = vpop.f32.mrb[3].mxu0 }
 0x235   :  { %v626_v63 = vpop.eup %625 }
 0x236   :  { %v628_v1 = vpop.eup %627 }
 0x237   :  { %v506_v28 = vcombine.low %v626_v63, %v628_v1  ;;  %v450_v2 = vpop.f32.mrb[0].mxu1 }
 0x238   :  { %629 = vtanh.f32 %v450_v2  ;;  %v452_v3 = vpop.f32.mrb[1].mxu1 }
 0x239   :  { %510 = vst [vmem:[%s901_s5] sm:$0xff] %v506_v28  ;;  %631 = vtanh.f32 %v452_v3  ;;  %v454_v6 = vpop.f32.mrb[2].mxu1 }
 0x23a   :  { %v455_v7 = vpop.f32.mrb[3].mxu1  ;;  %v491_v8 = vpop.f32.mrb[4].mxu0 }
 0x23b   :  { %633 = vtanh.f32 %v491_v8  ;;  %v536_v9 = vpop.f32.mrb[5].mxu0 }
 0x23c   :  { %v494_v13 = vpop.f32.mrb[6].mxu0 }
 0x23d   :  { %v537_v22 = vpop.f32.mrb[7].mxu0 }
 0x242   :  { %v630_v23 = vpop.eup %629 }
 0x243   :  { %v632_v24 = vpop.eup %631 }
 0x244   :  { %v507_v25 = vcombine.low %v630_v23, %v632_v24 }
 0x245   :  { %v634_v27 = vpop.eup %633 }
 0x246   :  { %511 = vst [vmem:[%s901_s5 + $0x8] sm:$0xff] %v507_v25  ;;  %513 = vst.msk [vmem:[%s901_s5 + $0x10] sm:$0xf] %vm512_vm6, %v634_v27 }

</bundles_post_ra>
